<compile_context>
chip_gen: v6e
topology: v6e:2x2x1
jax: 0.10.0
libtpu: 0.0.40
codegen_flags: <defaults>
</compile_context>

<pallas_src>
import functools

import jax
import jax.numpy as jnp
from jax import lax
from jax.experimental import pallas as pl
from jax.experimental.pallas import tpu as pltpu

EPS = 1e-5


def _round_up(x, m):
    return ((x + m - 1) // m) * m


# ---------------------------------------------------------------------------
# Fused BasicBlock kernel: one grid step == one batch element.
# ---------------------------------------------------------------------------
def _basic_block_kernel(xph_ref, w1_ref, b1_ref, w2_ref, b2_ref,
                        wsc_ref, bsc_ref, o_ref, out1_scr,
                        *, stride, Ho, Wo, Hph):
    s = stride
    cmid = w1_ref.shape[-1]
    cout = w2_ref.shape[-1]

    # Whole per-image (phase-decomposed, spatially padded) input tile.
    xv = xph_ref[0]                         # (s*s*Hph, Wph, Cin_p) f32

    # ---- conv1 (3x3, stride s) + folded BN1 + ReLU: 9 tap matmuls ----------
    acc1 = jnp.zeros((Ho * Wo, cmid), jnp.float32)
    for kh in range(3):
        for kw in range(3):
            base = ((kh % s) * s + (kw % s)) * Hph
            r0 = kh // s
            c0 = kw // s
            tap = xv[base + r0:base + r0 + Ho, c0:c0 + Wo, :]
            tap = tap.reshape(Ho * Wo, tap.shape[-1]).astype(jnp.bfloat16)
            acc1 = acc1 + jnp.dot(tap, w1_ref[kh * 3 + kw],
                                  preferred_element_type=jnp.float32)
    out1 = jnp.maximum(acc1 + b1_ref[...], 0.0)          # (Ho*Wo, cmid) f32

    # Stage conv1's output, zero-padded by 1 spatially, in VMEM so that
    # conv2's taps are contiguous static slices.
    out1_scr[...] = jnp.zeros_like(out1_scr)
    out1_scr[1:Ho + 1, 1:Wo + 1, :] = out1.reshape(Ho, Wo, cmid)

    # ---- conv2 (3x3, stride 1) + folded BN2 --------------------------------
    acc2 = jnp.zeros((Ho * Wo, cout), jnp.float32)
    for kh in range(3):
        for kw in range(3):
            tap = out1_scr[kh:kh + Ho, kw:kw + Wo, :]
            tap = tap.reshape(Ho * Wo, cmid).astype(jnp.bfloat16)
            acc2 = acc2 + jnp.dot(tap, w2_ref[kh * 3 + kw],
                                  preferred_element_type=jnp.float32)
    acc2 = acc2 + b2_ref[...]

    # ---- shortcut: 1x1 conv (stride s) + folded BN -------------------------
    # (identity shortcut uses an embedded identity weight matrix, bias = 0)
    base = ((1 % s) * s + (1 % s)) * Hph
    r0 = 1 // s
    xsc = xv[base + r0:base + r0 + Ho, r0:r0 + Wo, :]
    xsc = xsc.reshape(Ho * Wo, xsc.shape[-1]).astype(jnp.bfloat16)
    sc = jnp.dot(xsc, wsc_ref[...], preferred_element_type=jnp.float32)
    sc = sc + bsc_ref[...]

    # ---- residual add + final ReLU, lane-dense (128-wide) store ------------
    o_ref[0] = jnp.maximum(acc2 + sc, 0.0)


# ---------------------------------------------------------------------------
# Wrapper: layout prep (NCHW->NHWC, pad, phase split), BN folding, pallas_call
# ---------------------------------------------------------------------------
def _phase_decompose(xp, stride):
    """xp: (N, Hp, Wp, C) zero-padded input. Returns (N, s*s*Hph, Wph, C) with
    result[n, (a*s+b)*Hph + i, j, c] == xp[n, s*i + a, s*j + b, c]."""
    N, Hp, Wp, C = xp.shape
    s = stride
    Hph, Wph = Hp // s, Wp // s
    x = xp.reshape(N, Hph, s, Wph, s, C)
    x = jnp.transpose(x, (0, 2, 4, 1, 3, 5))
    return x.reshape(N, s * s * Hph, Wph, C), Hph, Wph


def basic_block_forward(x_nchw, params, *, stride, has_shortcut):
    N, Cin, H, W = x_nchw.shape
    Cout = params["w1"].shape[0]          # = planes (expansion == 1)
    s = stride
    assert (H + 2) % s == 0 and (W + 2) % s == 0  # TODO(synk): odd spatial dims

    Ho = (H + 2 - 3) // s + 1
    Wo = (W + 2 - 3) // s + 1

    cin_p = _round_up(Cin, 8)             # K-dim alignment for the MXU
    cmid_p = _round_up(Cout, 128)         # lane-dense intermediate channels
    cout_p = _round_up(Cout, 128)         # lane-dense output channels

    # ---- input: NCHW -> NHWC, spatial zero-pad 1, channel pad, phase split --
    x = jnp.transpose(x_nchw, (0, 2, 3, 1)).astype(jnp.float32)
    xp = jnp.pad(x, ((0, 0), (1, 1), (1, 1), (0, cin_p - Cin)))
    xph, Hph, Wph = _phase_decompose(xp, s)

    # ---- fold BN scales into conv weights, pad channel dims, cast to bf16 --
    def fold3x3(w_oihw, scale, cin_pad, cout_pad):
        w = jnp.transpose(w_oihw, (2, 3, 1, 0))            # (3, 3, Cin, Cout)
        w = w * scale[None, None, None, :]
        w = w.reshape(9, w.shape[2], w.shape[3])
        w = jnp.pad(w, ((0, 0), (0, cin_pad - w.shape[1]),
                        (0, cout_pad - w.shape[2])))
        return w.astype(jnp.bfloat16)

    w1 = fold3x3(params["w1"], params["s1"], cin_p, cmid_p)
    b1 = jnp.pad(params["b1"], (0, cmid_p - Cout)).reshape(1, cmid_p)
    b1 = b1.astype(jnp.float32)
    w2 = fold3x3(params["w2"], params["s2"], cmid_p, cout_p)
    b2 = jnp.pad(params["b2"], (0, cout_p - Cout)).reshape(1, cout_p)
    b2 = b2.astype(jnp.float32)

    if has_shortcut:
        wsc = params["w_sc"][:, :, 0, 0].T * params["s_sc"][None, :]  # (Cin, Cout)
        wsc = jnp.pad(wsc, ((0, cin_p - Cin), (0, cout_p - Cout)))
        wsc = wsc.astype(jnp.bfloat16)
        bsc = jnp.pad(params["b_sc"], (0, cout_p - Cout)).reshape(1, cout_p)
        bsc = bsc.astype(jnp.float32)
    else:
        assert Cin == Cout
        wsc = jnp.zeros((cin_p, cout_p), jnp.float32)
        wsc = wsc.at[:Cin, :Cin].set(jnp.eye(Cin, dtype=jnp.float32))
        wsc = wsc.astype(jnp.bfloat16)
        bsc = jnp.zeros((1, cout_p), jnp.float32)

    # ---- cost estimate (hint for XLA scheduling around the custom call) ----
    flops = int(2 * N * Ho * Wo *
                (9 * cin_p * cmid_p + 9 * cmid_p * cout_p + cin_p * cout_p))
    bytes_accessed = int(xph.size * 4 + w1.size * 2 + w2.size * 2 +
                         wsc.size * 2 + (b1.size + b2.size + bsc.size) * 4 +
                         N * Ho * Wo * cout_p * 4)

    kernel = functools.partial(_basic_block_kernel,
                               stride=s, Ho=Ho, Wo=Wo, Hph=Hph)

    out = pl.pallas_call(
        kernel,
        out_shape=jax.ShapeDtypeStruct((N, Ho * Wo, cout_p), jnp.float32),
        grid=(N,),
        in_specs=[
            pl.BlockSpec((1, s * s * Hph, Wph, cin_p), lambda n: (n, 0, 0, 0)),
            pl.BlockSpec((9, cin_p, cmid_p), lambda n: (0, 0, 0)),
            pl.BlockSpec((1, cmid_p), lambda n: (0, 0)),
            pl.BlockSpec((9, cmid_p, cout_p), lambda n: (0, 0, 0)),
            pl.BlockSpec((1, cout_p), lambda n: (0, 0)),
            pl.BlockSpec((cin_p, cout_p), lambda n: (0, 0)),
            pl.BlockSpec((1, cout_p), lambda n: (0, 0)),
        ],
        out_specs=pl.BlockSpec((1, Ho * Wo, cout_p), lambda n: (n, 0, 0)),
        scratch_shapes=[pltpu.VMEM((Ho + 2, Wo + 2, cmid_p), jnp.float32)],
        compiler_params=pltpu.CompilerParams(
            dimension_semantics=("parallel",),
            vmem_limit_bytes=32 * 1024 * 1024),
        cost_estimate=pl.CostEstimate(flops=flops, transcendentals=0,
                                      bytes_accessed=bytes_accessed),
    )(xph, w1, b1, w2, b2, wsc, bsc)

    out = out[:, :, :Cout].reshape(N, Ho, Wo, Cout)
    return jnp.transpose(out, (0, 3, 1, 2))               # NHWC -> NCHW


# ---------------------------------------------------------------------------
# Deterministic parameter init + pure-JAX f32 reference for verification
# ---------------------------------------------------------------------------
def init_params(key, in_planes, planes, stride):
    ks = jax.random.split(key, 16)

    def bn_raw(k):
        k1, k2, k3, k4 = jax.random.split(k, 4)
        gamma = jax.random.uniform(k1, (planes,), minval=0.5, maxval=1.5)
        beta = 0.1 * jax.random.normal(k2, (planes,))
        mean = 0.1 * jax.random.normal(k3, (planes,))
        var = jax.random.uniform(k4, (planes,), minval=0.5, maxval=1.5)
        return gamma, beta, mean, var

    def fold(bn):
        g, b, m, v = bn
        sc = g / jnp.sqrt(v + EPS)
        return sc, b - m * sc

    raw = {
        "w1": 0.1 * jax.random.normal(ks[0], (planes, in_planes, 3, 3)),
        "bn1": bn_raw(ks[1]),
        "w2": 0.1 * jax.random.normal(ks[2], (planes, planes, 3, 3)),
        "bn2": bn_raw(ks[3]),
    }
    has_shortcut = (stride != 1) or (in_planes != planes)
    if has_shortcut:
        raw["w_sc"] = 0.1 * jax.random.normal(ks[4], (planes, in_planes, 1, 1))
        raw["bn_sc"] = bn_raw(ks[5])

    p = {"w1": raw["w1"], "w2": raw["w2"]}
    p["s1"], p["b1"] = fold(raw["bn1"])
    p["s2"], p["b2"] = fold(raw["bn2"])
    if has_shortcut:
        p["w_sc"] = raw["w_sc"]
        p["s_sc"], p["b_sc"] = fold(raw["bn_sc"])
    return p, raw, has_shortcut


def ref_forward(x_nchw, raw, *, stride, has_shortcut):
    x = jnp.transpose(x_nchw, (0, 2, 3, 1))

    def conv(xh, w_oihw, s, pad):
        w = jnp.transpose(w_oihw, (2, 3, 1, 0))            # HWIO
        return lax.conv_general_dilated(
            xh, w, (s, s), [(pad, pad), (pad, pad)],
            dimension_numbers=("NHWC", "HWIO", "NHWC"))

    def bn(y, p):
        g, b, m, v = p
        return (y - m) / jnp.sqrt(v + EPS) * g + b

    out = jax.nn.relu(bn(conv(x, raw["w1"], stride, 1), raw["bn1"]))
    out2 = bn(conv(out, raw["w2"], 1, 1), raw["bn2"])
    sc = bn(conv(x, raw["w_sc"], stride, 0), raw["bn_sc"]) if has_shortcut else x
    out = jax.nn.relu(out2 + sc)
    return jnp.transpose(out, (0, 3, 1, 2))


if __name__ == "__main__":
    key = jax.random.PRNGKey(0)
    N, H, W = 2, 16, 16

    # (in_planes, planes, stride): projection-shortcut and identity-shortcut
    # variants of the BasicBlock.
    configs = [(4, 8, 2), (8, 8, 1)]

    for in_planes, planes, stride in configs:
        k_x, k_p, key = jax.random.split(key, 3)
        x = jax.random.normal(k_x, (N, in_planes, H, W), dtype=jnp.float32)
        params, raw, has_shortcut = init_params(k_p, in_planes, planes, stride)

        out = basic_block_forward(x, params, stride=stride,
                                  has_shortcut=has_shortcut)
        out = jax.block_until_ready(out)

        ref = jax.block_until_ready(
            ref_forward(x, raw, stride=stride, has_shortcut=has_shortcut))

        Ho = (H + 2 - 3) // stride + 1
        assert out.shape == (N, planes, Ho, Ho), out.shape
        # bf16 MXU operands vs a pure-f32 reference -> widened tolerance.
        err = float(jnp.max(jnp.abs(out - ref)))
        assert jnp.allclose(out, ref, rtol=5e-2, atol=5e-2), err

    print("KERNEL_OK")
</pallas_src>

<mosaic_0001>
module attributes {stable_mosaic.version = 11 : i64} {
  func.func @_basic_block_kernel(%arg0: i32, %arg1: memref<1x36x9x8xf32, #tpu.memory_space<vmem>>, %arg2: memref<9x8x128xbf16, #tpu.memory_space<vmem>>, %arg3: memref<1x128xf32, #tpu.memory_space<vmem>>, %arg4: memref<9x128x128xbf16, #tpu.memory_space<vmem>>, %arg5: memref<1x128xf32, #tpu.memory_space<vmem>>, %arg6: memref<8x128xbf16, #tpu.memory_space<vmem>>, %arg7: memref<1x128xf32, #tpu.memory_space<vmem>>, %arg8: memref<1x64x128xf32, #tpu.memory_space<vmem>>, %arg9: memref<10x10x128xf32, #tpu.memory_space<vmem>>) attributes {dimension_semantics = [#tpu.dimension_semantics<parallel>], iteration_bounds = array<i64: 2>, scalar_prefetch = 0 : i64, scratch_operands = 1 : i64, tpu.core_type = #tpu.core_type<tc>, window_params = [{transform_indices = @transform_0, window_bounds = array<i64: 1, 36, 9, 8>}, {pipeline_mode = #tpu.pipeline_mode<synchronous>, transform_indices = @transform_1, window_bounds = array<i64: 9, 8, 128>}, {pipeline_mode = #tpu.pipeline_mode<synchronous>, transform_indices = @transform_2, window_bounds = array<i64: 1, 128>}, {pipeline_mode = #tpu.pipeline_mode<synchronous>, transform_indices = @transform_3, window_bounds = array<i64: 9, 128, 128>}, {pipeline_mode = #tpu.pipeline_mode<synchronous>, transform_indices = @transform_4, window_bounds = array<i64: 1, 128>}, {pipeline_mode = #tpu.pipeline_mode<synchronous>, transform_indices = @transform_5, window_bounds = array<i64: 8, 128>}, {pipeline_mode = #tpu.pipeline_mode<synchronous>, transform_indices = @transform_6, window_bounds = array<i64: 1, 128>}, {transform_indices = @transform_7, window_bounds = array<i64: 1, 64, 128>}]} {
    %c0 = arith.constant 0 : index
    %c0_0 = arith.constant 0 : index
    %c0_1 = arith.constant 0 : index
    %c0_2 = arith.constant 0 : index
    %0 = vector.load %arg1[%c0, %c0_0, %c0_1, %c0_2] : memref<1x36x9x8xf32, #tpu.memory_space<vmem>>, vector<1x36x9x8xf32>
    %1 = vector.shape_cast %0 : vector<1x36x9x8xf32> to vector<36x9x8xf32>
    %cst = arith.constant 0.000000e+00 : f32
    %2 = vector.broadcast %cst : f32 to vector<64x128xf32>
    %3 = vector.extract_strided_slice %1 {offsets = [0, 0, 0], sizes = [8, 8, 8], strides = [1, 1, 1]} : vector<36x9x8xf32> to vector<8x8x8xf32>
    %4 = vector.shape_cast %3 : vector<8x8x8xf32> to vector<64x8xf32>
    %5 = arith.truncf %4 : vector<64x8xf32> to vector<64x8xbf16>
    %c0_3 = arith.constant 0 : index
    %c0_4 = arith.constant 0 : index
    %c0_5 = arith.constant 0 : index
    %6 = vector.load %arg2[%c0_3, %c0_4, %c0_5] : memref<9x8x128xbf16, #tpu.memory_space<vmem>>, vector<1x8x128xbf16>
    %7 = vector.shape_cast %6 : vector<1x8x128xbf16> to vector<8x128xbf16>
    %cst_6 = arith.constant dense<0.000000e+00> : vector<64x128xf32>
    %8 = tpu.matmul %5, %7, %cst_6 {dimension_numbers = #tpu.dot_dimension_numbers<[1], [0], [0], [1], [0, 0, 1, 1], [], []>} : vector<64x8xbf16>, vector<8x128xbf16>, vector<64x128xf32> -> vector<64x128xf32>
    %9 = arith.addf %2, %8 : vector<64x128xf32>
    %10 = vector.extract_strided_slice %1 {offsets = [9, 0, 0], sizes = [8, 8, 8], strides = [1, 1, 1]} : vector<36x9x8xf32> to vector<8x8x8xf32>
    %11 = vector.shape_cast %10 : vector<8x8x8xf32> to vector<64x8xf32>
    %12 = arith.truncf %11 : vector<64x8xf32> to vector<64x8xbf16>
    %c1 = arith.constant 1 : index
    %c0_7 = arith.constant 0 : index
    %c0_8 = arith.constant 0 : index
    %13 = vector.load %arg2[%c1, %c0_7, %c0_8] : memref<9x8x128xbf16, #tpu.memory_space<vmem>>, vector<1x8x128xbf16>
    %14 = vector.shape_cast %13 : vector<1x8x128xbf16> to vector<8x128xbf16>
    %cst_9 = arith.constant dense<0.000000e+00> : vector<64x128xf32>
    %15 = tpu.matmul %12, %14, %cst_9 {dimension_numbers = #tpu.dot_dimension_numbers<[1], [0], [0], [1], [0, 0, 1, 1], [], []>} : vector<64x8xbf16>, vector<8x128xbf16>, vector<64x128xf32> -> vector<64x128xf32>
    %16 = arith.addf %9, %15 : vector<64x128xf32>
    %17 = vector.extract_strided_slice %1 {offsets = [0, 1, 0], sizes = [8, 8, 8], strides = [1, 1, 1]} : vector<36x9x8xf32> to vector<8x8x8xf32>
    %18 = vector.shape_cast %17 : vector<8x8x8xf32> to vector<64x8xf32>
    %19 = arith.truncf %18 : vector<64x8xf32> to vector<64x8xbf16>
    %c2 = arith.constant 2 : index
    %c0_10 = arith.constant 0 : index
    %c0_11 = arith.constant 0 : index
    %20 = vector.load %arg2[%c2, %c0_10, %c0_11] : memref<9x8x128xbf16, #tpu.memory_space<vmem>>, vector<1x8x128xbf16>
    %21 = vector.shape_cast %20 : vector<1x8x128xbf16> to vector<8x128xbf16>
    %cst_12 = arith.constant dense<0.000000e+00> : vector<64x128xf32>
    %22 = tpu.matmul %19, %21, %cst_12 {dimension_numbers = #tpu.dot_dimension_numbers<[1], [0], [0], [1], [0, 0, 1, 1], [], []>} : vector<64x8xbf16>, vector<8x128xbf16>, vector<64x128xf32> -> vector<64x128xf32>
    %23 = arith.addf %16, %22 : vector<64x128xf32>
    %24 = vector.extract_strided_slice %1 {offsets = [18, 0, 0], sizes = [8, 8, 8], strides = [1, 1, 1]} : vector<36x9x8xf32> to vector<8x8x8xf32>
    %25 = vector.shape_cast %24 : vector<8x8x8xf32> to vector<64x8xf32>
    %26 = arith.truncf %25 : vector<64x8xf32> to vector<64x8xbf16>
    %c3 = arith.constant 3 : index
    %c0_13 = arith.constant 0 : index
    %c0_14 = arith.constant 0 : index
    %27 = vector.load %arg2[%c3, %c0_13, %c0_14] : memref<9x8x128xbf16, #tpu.memory_space<vmem>>, vector<1x8x128xbf16>
    %28 = vector.shape_cast %27 : vector<1x8x128xbf16> to vector<8x128xbf16>
    %cst_15 = arith.constant dense<0.000000e+00> : vector<64x128xf32>
    %29 = tpu.matmul %26, %28, %cst_15 {dimension_numbers = #tpu.dot_dimension_numbers<[1], [0], [0], [1], [0, 0, 1, 1], [], []>} : vector<64x8xbf16>, vector<8x128xbf16>, vector<64x128xf32> -> vector<64x128xf32>
    %30 = arith.addf %23, %29 : vector<64x128xf32>
    %31 = vector.extract_strided_slice %1 {offsets = [27, 0, 0], sizes = [8, 8, 8], strides = [1, 1, 1]} : vector<36x9x8xf32> to vector<8x8x8xf32>
    %32 = vector.shape_cast %31 : vector<8x8x8xf32> to vector<64x8xf32>
    %33 = arith.truncf %32 : vector<64x8xf32> to vector<64x8xbf16>
    %c4 = arith.constant 4 : index
    %c0_16 = arith.constant 0 : index
    %c0_17 = arith.constant 0 : index
    %34 = vector.load %arg2[%c4, %c0_16, %c0_17] : memref<9x8x128xbf16, #tpu.memory_space<vmem>>, vector<1x8x128xbf16>
    %35 = vector.shape_cast %34 : vector<1x8x128xbf16> to vector<8x128xbf16>
    %cst_18 = arith.constant dense<0.000000e+00> : vector<64x128xf32>
    %36 = tpu.matmul %33, %35, %cst_18 {dimension_numbers = #tpu.dot_dimension_numbers<[1], [0], [0], [1], [0, 0, 1, 1], [], []>} : vector<64x8xbf16>, vector<8x128xbf16>, vector<64x128xf32> -> vector<64x128xf32>
    %37 = arith.addf %30, %36 : vector<64x128xf32>
    %38 = vector.extract_strided_slice %1 {offsets = [18, 1, 0], sizes = [8, 8, 8], strides = [1, 1, 1]} : vector<36x9x8xf32> to vector<8x8x8xf32>
    %39 = vector.shape_cast %38 : vector<8x8x8xf32> to vector<64x8xf32>
    %40 = arith.truncf %39 : vector<64x8xf32> to vector<64x8xbf16>
    %c5 = arith.constant 5 : index
    %c0_19 = arith.constant 0 : index
    %c0_20 = arith.constant 0 : index
    %41 = vector.load %arg2[%c5, %c0_19, %c0_20] : memref<9x8x128xbf16, #tpu.memory_space<vmem>>, vector<1x8x128xbf16>
    %42 = vector.shape_cast %41 : vector<1x8x128xbf16> to vector<8x128xbf16>
    %cst_21 = arith.constant dense<0.000000e+00> : vector<64x128xf32>
    %43 = tpu.matmul %40, %42, %cst_21 {dimension_numbers = #tpu.dot_dimension_numbers<[1], [0], [0], [1], [0, 0, 1, 1], [], []>} : vector<64x8xbf16>, vector<8x128xbf16>, vector<64x128xf32> -> vector<64x128xf32>
    %44 = arith.addf %37, %43 : vector<64x128xf32>
    %45 = vector.extract_strided_slice %1 {offsets = [1, 0, 0], sizes = [8, 8, 8], strides = [1, 1, 1]} : vector<36x9x8xf32> to vector<8x8x8xf32>
    %46 = vector.shape_cast %45 : vector<8x8x8xf32> to vector<64x8xf32>
    %47 = arith.truncf %46 : vector<64x8xf32> to vector<64x8xbf16>
    %c6 = arith.constant 6 : index
    %c0_22 = arith.constant 0 : index
    %c0_23 = arith.constant 0 : index
    %48 = vector.load %arg2[%c6, %c0_22, %c0_23] : memref<9x8x128xbf16, #tpu.memory_space<vmem>>, vector<1x8x128xbf16>
    %49 = vector.shape_cast %48 : vector<1x8x128xbf16> to vector<8x128xbf16>
    %cst_24 = arith.constant dense<0.000000e+00> : vector<64x128xf32>
    %50 = tpu.matmul %47, %49, %cst_24 {dimension_numbers = #tpu.dot_dimension_numbers<[1], [0], [0], [1], [0, 0, 1, 1], [], []>} : vector<64x8xbf16>, vector<8x128xbf16>, vector<64x128xf32> -> vector<64x128xf32>
    %51 = arith.addf %44, %50 : vector<64x128xf32>
    %52 = vector.extract_strided_slice %1 {offsets = [10, 0, 0], sizes = [8, 8, 8], strides = [1, 1, 1]} : vector<36x9x8xf32> to vector<8x8x8xf32>
    %53 = vector.shape_cast %52 : vector<8x8x8xf32> to vector<64x8xf32>
    %54 = arith.truncf %53 : vector<64x8xf32> to vector<64x8xbf16>
    %c7 = arith.constant 7 : index
    %c0_25 = arith.constant 0 : index
    %c0_26 = arith.constant 0 : index
    %55 = vector.load %arg2[%c7, %c0_25, %c0_26] : memref<9x8x128xbf16, #tpu.memory_space<vmem>>, vector<1x8x128xbf16>
    %56 = vector.shape_cast %55 : vector<1x8x128xbf16> to vector<8x128xbf16>
    %cst_27 = arith.constant dense<0.000000e+00> : vector<64x128xf32>
    %57 = tpu.matmul %54, %56, %cst_27 {dimension_numbers = #tpu.dot_dimension_numbers<[1], [0], [0], [1], [0, 0, 1, 1], [], []>} : vector<64x8xbf16>, vector<8x128xbf16>, vector<64x128xf32> -> vector<64x128xf32>
    %58 = arith.addf %51, %57 : vector<64x128xf32>
    %59 = vector.extract_strided_slice %1 {offsets = [1, 1, 0], sizes = [8, 8, 8], strides = [1, 1, 1]} : vector<36x9x8xf32> to vector<8x8x8xf32>
    %60 = vector.shape_cast %59 : vector<8x8x8xf32> to vector<64x8xf32>
    %61 = arith.truncf %60 : vector<64x8xf32> to vector<64x8xbf16>
    %c8 = arith.constant 8 : index
    %c0_28 = arith.constant 0 : index
    %c0_29 = arith.constant 0 : index
    %62 = vector.load %arg2[%c8, %c0_28, %c0_29] : memref<9x8x128xbf16, #tpu.memory_space<vmem>>, vector<1x8x128xbf16>
    %63 = vector.shape_cast %62 : vector<1x8x128xbf16> to vector<8x128xbf16>
    %cst_30 = arith.constant dense<0.000000e+00> : vector<64x128xf32>
    %64 = tpu.matmul %61, %63, %cst_30 {dimension_numbers = #tpu.dot_dimension_numbers<[1], [0], [0], [1], [0, 0, 1, 1], [], []>} : vector<64x8xbf16>, vector<8x128xbf16>, vector<64x128xf32> -> vector<64x128xf32>
    %65 = arith.addf %58, %64 : vector<64x128xf32>
    %c0_31 = arith.constant 0 : index
    %c0_32 = arith.constant 0 : index
    %66 = vector.load %arg3[%c0_31, %c0_32] : memref<1x128xf32, #tpu.memory_space<vmem>>, vector<1x128xf32>
    %67 = vector.broadcast %66 : vector<1x128xf32> to vector<64x128xf32>
    %68 = arith.addf %65, %67 : vector<64x128xf32>
    %cst_33 = arith.constant 0.000000e+00 : f32
    %69 = vector.broadcast %cst_33 : f32 to vector<64x128xf32>
    %70 = arith.maximumf %68, %69 : vector<64x128xf32>
    %cst_34 = arith.constant 0.000000e+00 : f32
    %71 = vector.broadcast %cst_34 : f32 to vector<10x10x128xf32>
    %c0_35 = arith.constant 0 : index
    %c0_36 = arith.constant 0 : index
    %c0_37 = arith.constant 0 : index
    %72 = vector.load %arg9[%c0_35, %c0_36, %c0_37] : memref<10x10x128xf32, #tpu.memory_space<vmem>>, vector<10x10x128xf32>
    tpu.vector_store %arg9[%c0_35, %c0_36, %c0_37], %71 {strides = array<i32>} : memref<10x10x128xf32, #tpu.memory_space<vmem>>, vector<10x10x128xf32>,
    %73 = vector.shape_cast %70 : vector<64x128xf32> to vector<8x8x128xf32>
    %c1_38 = arith.constant 1 : index
    %c1_39 = arith.constant 1 : index
    %c0_40 = arith.constant 0 : index
    %74 = vector.load %arg9[%c1_38, %c1_39, %c0_40] : memref<10x10x128xf32, #tpu.memory_space<vmem>>, vector<8x8x128xf32>
    tpu.vector_store %arg9[%c1_38, %c1_39, %c0_40], %73 {strides = array<i32>} : memref<10x10x128xf32, #tpu.memory_space<vmem>>, vector<8x8x128xf32>,
    %cst_41 = arith.constant 0.000000e+00 : f32
    %75 = vector.broadcast %cst_41 : f32 to vector<64x128xf32>
    %c0_42 = arith.constant 0 : index
    %c0_43 = arith.constant 0 : index
    %c0_44 = arith.constant 0 : index
    %76 = vector.load %arg9[%c0_42, %c0_43, %c0_44] : memref<10x10x128xf32, #tpu.memory_space<vmem>>, vector<8x8x128xf32>
    %77 = vector.shape_cast %76 : vector<8x8x128xf32> to vector<64x128xf32>
    %78 = arith.truncf %77 : vector<64x128xf32> to vector<64x128xbf16>
    %c0_45 = arith.constant 0 : index
    %c0_46 = arith.constant 0 : index
    %c0_47 = arith.constant 0 : index
    %79 = vector.load %arg4[%c0_45, %c0_46, %c0_47] : memref<9x128x128xbf16, #tpu.memory_space<vmem>>, vector<1x128x128xbf16>
    %80 = vector.shape_cast %79 : vector<1x128x128xbf16> to vector<128x128xbf16>
    %cst_48 = arith.constant dense<0.000000e+00> : vector<64x128xf32>
    %81 = tpu.matmul %78, %80, %cst_48 {dimension_numbers = #tpu.dot_dimension_numbers<[1], [0], [0], [1], [0, 0, 1, 1], [], []>} : vector<64x128xbf16>, vector<128x128xbf16>, vector<64x128xf32> -> vector<64x128xf32>
    %82 = arith.addf %75, %81 : vector<64x128xf32>
    %c0_49 = arith.constant 0 : index
    %c1_50 = arith.constant 1 : index
    %c0_51 = arith.constant 0 : index
    %83 = vector.load %arg9[%c0_49, %c1_50, %c0_51] : memref<10x10x128xf32, #tpu.memory_space<vmem>>, vector<8x8x128xf32>
    %84 = vector.shape_cast %83 : vector<8x8x128xf32> to vector<64x128xf32>
    %85 = arith.truncf %84 : vector<64x128xf32> to vector<64x128xbf16>
    %c1_52 = arith.constant 1 : index
    %c0_53 = arith.constant 0 : index
    %c0_54 = arith.constant 0 : index
    %86 = vector.load %arg4[%c1_52, %c0_53, %c0_54] : memref<9x128x128xbf16, #tpu.memory_space<vmem>>, vector<1x128x128xbf16>
    %87 = vector.shape_cast %86 : vector<1x128x128xbf16> to vector<128x128xbf16>
    %cst_55 = arith.constant dense<0.000000e+00> : vector<64x128xf32>
    %88 = tpu.matmul %85, %87, %cst_55 {dimension_numbers = #tpu.dot_dimension_numbers<[1], [0], [0], [1], [0, 0, 1, 1], [], []>} : vector<64x128xbf16>, vector<128x128xbf16>, vector<64x128xf32> -> vector<64x128xf32>
    %89 = arith.addf %82, %88 : vector<64x128xf32>
    %c0_56 = arith.constant 0 : index
    %c2_57 = arith.constant 2 : index
    %c0_58 = arith.constant 0 : index
    %90 = vector.load %arg9[%c0_56, %c2_57, %c0_58] : memref<10x10x128xf32, #tpu.memory_space<vmem>>, vector<8x8x128xf32>
    %91 = vector.shape_cast %90 : vector<8x8x128xf32> to vector<64x128xf32>
    %92 = arith.truncf %91 : vector<64x128xf32> to vector<64x128xbf16>
    %c2_59 = arith.constant 2 : index
    %c0_60 = arith.constant 0 : index
    %c0_61 = arith.constant 0 : index
    %93 = vector.load %arg4[%c2_59, %c0_60, %c0_61] : memref<9x128x128xbf16, #tpu.memory_space<vmem>>, vector<1x128x128xbf16>
    %94 = vector.shape_cast %93 : vector<1x128x128xbf16> to vector<128x128xbf16>
    %cst_62 = arith.constant dense<0.000000e+00> : vector<64x128xf32>
    %95 = tpu.matmul %92, %94, %cst_62 {dimension_numbers = #tpu.dot_dimension_numbers<[1], [0], [0], [1], [0, 0, 1, 1], [], []>} : vector<64x128xbf16>, vector<128x128xbf16>, vector<64x128xf32> -> vector<64x128xf32>
    %96 = arith.addf %89, %95 : vector<64x128xf32>
    %c1_63 = arith.constant 1 : index
    %c0_64 = arith.constant 0 : index
    %c0_65 = arith.constant 0 : index
    %97 = vector.load %arg9[%c1_63, %c0_64, %c0_65] : memref<10x10x128xf32, #tpu.memory_space<vmem>>, vector<8x8x128xf32>
    %98 = vector.shape_cast %97 : vector<8x8x128xf32> to vector<64x128xf32>
    %99 = arith.truncf %98 : vector<64x128xf32> to vector<64x128xbf16>
    %c3_66 = arith.constant 3 : index
    %c0_67 = arith.constant 0 : index
    %c0_68 = arith.constant 0 : index
    %100 = vector.load %arg4[%c3_66, %c0_67, %c0_68] : memref<9x128x128xbf16, #tpu.memory_space<vmem>>, vector<1x128x128xbf16>
    %101 = vector.shape_cast %100 : vector<1x128x128xbf16> to vector<128x128xbf16>
    %cst_69 = arith.constant dense<0.000000e+00> : vector<64x128xf32>
    %102 = tpu.matmul %99, %101, %cst_69 {dimension_numbers = #tpu.dot_dimension_numbers<[1], [0], [0], [1], [0, 0, 1, 1], [], []>} : vector<64x128xbf16>, vector<128x128xbf16>, vector<64x128xf32> -> vector<64x128xf32>
    %103 = arith.addf %96, %102 : vector<64x128xf32>
    %c1_70 = arith.constant 1 : index
    %c1_71 = arith.constant 1 : index
    %c0_72 = arith.constant 0 : index
    %104 = vector.load %arg9[%c1_70, %c1_71, %c0_72] : memref<10x10x128xf32, #tpu.memory_space<vmem>>, vector<8x8x128xf32>
    %105 = vector.shape_cast %104 : vector<8x8x128xf32> to vector<64x128xf32>
    %106 = arith.truncf %105 : vector<64x128xf32> to vector<64x128xbf16>
    %c4_73 = arith.constant 4 : index
    %c0_74 = arith.constant 0 : index
    %c0_75 = arith.constant 0 : index
    %107 = vector.load %arg4[%c4_73, %c0_74, %c0_75] : memref<9x128x128xbf16, #tpu.memory_space<vmem>>, vector<1x128x128xbf16>
    %108 = vector.shape_cast %107 : vector<1x128x128xbf16> to vector<128x128xbf16>
    %cst_76 = arith.constant dense<0.000000e+00> : vector<64x128xf32>
    %109 = tpu.matmul %106, %108, %cst_76 {dimension_numbers = #tpu.dot_dimension_numbers<[1], [0], [0], [1], [0, 0, 1, 1], [], []>} : vector<64x128xbf16>, vector<128x128xbf16>, vector<64x128xf32> -> vector<64x128xf32>
    %110 = arith.addf %103, %109 : vector<64x128xf32>
    %c1_77 = arith.constant 1 : index
    %c2_78 = arith.constant 2 : index
    %c0_79 = arith.constant 0 : index
    %111 = vector.load %arg9[%c1_77, %c2_78, %c0_79] : memref<10x10x128xf32, #tpu.memory_space<vmem>>, vector<8x8x128xf32>
    %112 = vector.shape_cast %111 : vector<8x8x128xf32> to vector<64x128xf32>
    %113 = arith.truncf %112 : vector<64x128xf32> to vector<64x128xbf16>
    %c5_80 = arith.constant 5 : index
    %c0_81 = arith.constant 0 : index
    %c0_82 = arith.constant 0 : index
    %114 = vector.load %arg4[%c5_80, %c0_81, %c0_82] : memref<9x128x128xbf16, #tpu.memory_space<vmem>>, vector<1x128x128xbf16>
    %115 = vector.shape_cast %114 : vector<1x128x128xbf16> to vector<128x128xbf16>
    %cst_83 = arith.constant dense<0.000000e+00> : vector<64x128xf32>
    %116 = tpu.matmul %113, %115, %cst_83 {dimension_numbers = #tpu.dot_dimension_numbers<[1], [0], [0], [1], [0, 0, 1, 1], [], []>} : vector<64x128xbf16>, vector<128x128xbf16>, vector<64x128xf32> -> vector<64x128xf32>
    %117 = arith.addf %110, %116 : vector<64x128xf32>
    %c2_84 = arith.constant 2 : index
    %c0_85 = arith.constant 0 : index
    %c0_86 = arith.constant 0 : index
    %118 = vector.load %arg9[%c2_84, %c0_85, %c0_86] : memref<10x10x128xf32, #tpu.memory_space<vmem>>, vector<8x8x128xf32>
    %119 = vector.shape_cast %118 : vector<8x8x128xf32> to vector<64x128xf32>
    %120 = arith.truncf %119 : vector<64x128xf32> to vector<64x128xbf16>
    %c6_87 = arith.constant 6 : index
    %c0_88 = arith.constant 0 : index
    %c0_89 = arith.constant 0 : index
    %121 = vector.load %arg4[%c6_87, %c0_88, %c0_89] : memref<9x128x128xbf16, #tpu.memory_space<vmem>>, vector<1x128x128xbf16>
    %122 = vector.shape_cast %121 : vector<1x128x128xbf16> to vector<128x128xbf16>
    %cst_90 = arith.constant dense<0.000000e+00> : vector<64x128xf32>
    %123 = tpu.matmul %120, %122, %cst_90 {dimension_numbers = #tpu.dot_dimension_numbers<[1], [0], [0], [1], [0, 0, 1, 1], [], []>} : vector<64x128xbf16>, vector<128x128xbf16>, vector<64x128xf32> -> vector<64x128xf32>
    %124 = arith.addf %117, %123 : vector<64x128xf32>
    %c2_91 = arith.constant 2 : index
    %c1_92 = arith.constant 1 : index
    %c0_93 = arith.constant 0 : index
    %125 = vector.load %arg9[%c2_91, %c1_92, %c0_93] : memref<10x10x128xf32, #tpu.memory_space<vmem>>, vector<8x8x128xf32>
    %126 = vector.shape_cast %125 : vector<8x8x128xf32> to vector<64x128xf32>
    %127 = arith.truncf %126 : vector<64x128xf32> to vector<64x128xbf16>
    %c7_94 = arith.constant 7 : index
    %c0_95 = arith.constant 0 : index
    %c0_96 = arith.constant 0 : index
    %128 = vector.load %arg4[%c7_94, %c0_95, %c0_96] : memref<9x128x128xbf16, #tpu.memory_space<vmem>>, vector<1x128x128xbf16>
    %129 = vector.shape_cast %128 : vector<1x128x128xbf16> to vector<128x128xbf16>
    %cst_97 = arith.constant dense<0.000000e+00> : vector<64x128xf32>
    %130 = tpu.matmul %127, %129, %cst_97 {dimension_numbers = #tpu.dot_dimension_numbers<[1], [0], [0], [1], [0, 0, 1, 1], [], []>} : vector<64x128xbf16>, vector<128x128xbf16>, vector<64x128xf32> -> vector<64x128xf32>
    %131 = arith.addf %124, %130 : vector<64x128xf32>
    %c2_98 = arith.constant 2 : index
    %c2_99 = arith.constant 2 : index
    %c0_100 = arith.constant 0 : index
    %132 = vector.load %arg9[%c2_98, %c2_99, %c0_100] : memref<10x10x128xf32, #tpu.memory_space<vmem>>, vector<8x8x128xf32>
    %133 = vector.shape_cast %132 : vector<8x8x128xf32> to vector<64x128xf32>
    %134 = arith.truncf %133 : vector<64x128xf32> to vector<64x128xbf16>
    %c8_101 = arith.constant 8 : index
    %c0_102 = arith.constant 0 : index
    %c0_103 = arith.constant 0 : index
    %135 = vector.load %arg4[%c8_101, %c0_102, %c0_103] : memref<9x128x128xbf16, #tpu.memory_space<vmem>>, vector<1x128x128xbf16>
    %136 = vector.shape_cast %135 : vector<1x128x128xbf16> to vector<128x128xbf16>
    %cst_104 = arith.constant dense<0.000000e+00> : vector<64x128xf32>
    %137 = tpu.matmul %134, %136, %cst_104 {dimension_numbers = #tpu.dot_dimension_numbers<[1], [0], [0], [1], [0, 0, 1, 1], [], []>} : vector<64x128xbf16>, vector<128x128xbf16>, vector<64x128xf32> -> vector<64x128xf32>
    %138 = arith.addf %131, %137 : vector<64x128xf32>
    %c0_105 = arith.constant 0 : index
    %c0_106 = arith.constant 0 : index
    %139 = vector.load %arg5[%c0_105, %c0_106] : memref<1x128xf32, #tpu.memory_space<vmem>>, vector<1x128xf32>
    %140 = vector.broadcast %139 : vector<1x128xf32> to vector<64x128xf32>
    %141 = arith.addf %138, %140 : vector<64x128xf32>
    %142 = vector.extract_strided_slice %1 {offsets = [27, 0, 0], sizes = [8, 8, 8], strides = [1, 1, 1]} : vector<36x9x8xf32> to vector<8x8x8xf32>
    %143 = vector.shape_cast %142 : vector<8x8x8xf32> to vector<64x8xf32>
    %144 = arith.truncf %143 : vector<64x8xf32> to vector<64x8xbf16>
    %c0_107 = arith.constant 0 : index
    %c0_108 = arith.constant 0 : index
    %145 = vector.load %arg6[%c0_107, %c0_108] : memref<8x128xbf16, #tpu.memory_space<vmem>>, vector<8x128xbf16>
    %cst_109 = arith.constant dense<0.000000e+00> : vector<64x128xf32>
    %146 = tpu.matmul %144, %145, %cst_109 {dimension_numbers = #tpu.dot_dimension_numbers<[1], [0], [0], [1], [0, 0, 1, 1], [], []>} : vector<64x8xbf16>, vector<8x128xbf16>, vector<64x128xf32> -> vector<64x128xf32>
    %c0_110 = arith.constant 0 : index
    %c0_111 = arith.constant 0 : index
    %147 = vector.load %arg7[%c0_110, %c0_111] : memref<1x128xf32, #tpu.memory_space<vmem>>, vector<1x128xf32>
    %148 = vector.broadcast %147 : vector<1x128xf32> to vector<64x128xf32>
    %149 = arith.addf %146, %148 : vector<64x128xf32>
    %150 = arith.addf %141, %149 : vector<64x128xf32>
    %cst_112 = arith.constant 0.000000e+00 : f32
    %151 = vector.broadcast %cst_112 : f32 to vector<64x128xf32>
    %152 = arith.maximumf %150, %151 : vector<64x128xf32>
    %c0_113 = arith.constant 0 : index
    %c0_114 = arith.constant 0 : index
    %c0_115 = arith.constant 0 : index
    %153 = vector.load %arg8[%c0_113, %c0_114, %c0_115] : memref<1x64x128xf32, #tpu.memory_space<vmem>>, vector<1x64x128xf32>
    %154 = vector.shape_cast %153 : vector<1x64x128xf32> to vector<64x128xf32>
    %155 = vector.shape_cast %152 : vector<64x128xf32> to vector<1x64x128xf32>
    tpu.vector_store %arg8[%c0_113, %c0_114, %c0_115], %155 {strides = array<i32>} : memref<1x64x128xf32, #tpu.memory_space<vmem>>, vector<1x64x128xf32>,
    return
  }
  func.func @transform_0(%arg0: i32) -> (i32, i32, i32, i32) {
    %c0_i32 = arith.constant 0 : i32
    %c0_i32_0 = arith.constant 0 : i32
    %c0_i32_1 = arith.constant 0 : i32
    %c0_i32_2 = arith.constant 0 : i32
    return %arg0, %c0_i32, %c0_i32_0, %c0_i32_1 : i32, i32, i32, i32
  }
  func.func @transform_1(%arg0: i32) -> (i32, i32, i32) {
    %c0_i32 = arith.constant 0 : i32
    %c0_i32_0 = arith.constant 0 : i32
    %c0_i32_1 = arith.constant 0 : i32
    %c0_i32_2 = arith.constant 0 : i32
    return %c0_i32, %c0_i32_0, %c0_i32_1 : i32, i32, i32
  }
  func.func @transform_2(%arg0: i32) -> (i32, i32) {
    %c0_i32 = arith.constant 0 : i32
    %c0_i32_0 = arith.constant 0 : i32
    %c0_i32_1 = arith.constant 0 : i32
    return %c0_i32, %c0_i32_0 : i32, i32
  }
  func.func @transform_3(%arg0: i32) -> (i32, i32, i32) {
    %c0_i32 = arith.constant 0 : i32
    %c0_i32_0 = arith.constant 0 : i32
    %c0_i32_1 = arith.constant 0 : i32
    %c0_i32_2 = arith.constant 0 : i32
    return %c0_i32, %c0_i32_0, %c0_i32_1 : i32, i32, i32
  }
  func.func @transform_4(%arg0: i32) -> (i32, i32) {
    %c0_i32 = arith.constant 0 : i32
    %c0_i32_0 = arith.constant 0 : i32
    %c0_i32_1 = arith.constant 0 : i32
    return %c0_i32, %c0_i32_0 : i32, i32
  }
  func.func @transform_5(%arg0: i32) -> (i32, i32) {
    %c0_i32 = arith.constant 0 : i32
    %c0_i32_0 = arith.constant 0 : i32
    %c0_i32_1 = arith.constant 0 : i32
    return %c0_i32, %c0_i32_0 : i32, i32
  }
  func.func @transform_6(%arg0: i32) -> (i32, i32) {
    %c0_i32 = arith.constant 0 : i32
    %c0_i32_0 = arith.constant 0 : i32
    %c0_i32_1 = arith.constant 0 : i32
    return %c0_i32, %c0_i32_0 : i32, i32
  }
  func.func @transform_7(%arg0: i32) -> (i32, i32, i32) {
    %c0_i32 = arith.constant 0 : i32
    %c0_i32_0 = arith.constant 0 : i32
    %c0_i32_1 = arith.constant 0 : i32
    return %arg0, %c0_i32, %c0_i32_0 : i32, i32, i32
  }
}

</mosaic_0001>

<bundles_post_ra>
// kernel: tpu_custom_call.1
= control target key start
LH: loop header
LB: loop body
LE: loop exit
PB: predicated region body
PF: predicated region fallthrough
CT: control target
= control target key end

     0   :  { %12 = vsyncpa [#allocation4], 0  ;;  %s4795_s0 = inlined_call_operand.vmem [shape: f32[2,36,9,8], index: 0, kind: input, shape index: {}]   ;;  %s4796_s1 = inlined_call_operand.vmem [shape: bf16[9,8,128], index: 1, kind: input, shape index: {}]   ;;  %s4797_s2 = inlined_call_operand.vmem [shape: f32[1,128], index: 2, kind: input, shape index: {}]   ;;  %s4798_s3 = inlined_call_operand.vmem [shape: bf16[9,128,128], index: 3, kind: input, shape index: {}]   ;;  %s4799_s4 = inlined_call_operand.vmem [shape: f32[1,128], index: 4, kind: input, shape index: {}]   ;;  %s4800_s5 = inlined_call_operand.vmem [shape: bf16[8,128], index: 5, kind: input, shape index: {}]   ;;  %s4801_s6 = inlined_call_operand.vmem [shape: f32[1,128], index: 6, kind: input, shape index: {}]   ;;  %s4802_s7 = inlined_call_operand.hbm [shape: f32[2,64,128], index: 7, kind: output, shape index: {}]  }
   0x1   :  { %14 = vsyncpa [#allocation4 + $0x1], 0  ;;  %s3808_s24 = smov 0   ;;  %s3810_s25 = smov 0  }
   0x2   :  { %s3812_s26 = smov 0   ;;  %s3814_s27 = smov 0  }
   0x3 LB: > { %s3829_s28 = sadd.s32 4294967295, %s3762_s27   ;;  %s2840_s29 = sadd.s32 4294967294, %s3762_s27   ;;  %s3762_s27 = sphi %s3814_s27, %s4856_s27   ;;  %s3758_s26 = sphi %s3812_s26, %s4855_s26   ;;  %s3754_s25 = sphi %s3810_s25, %s4854_s25   ;;  %s3750_s24 = sphi %s3808_s24, %s4853_s24  }
   0x4   : > { %s3833_s30 = sadd.s32 1, %s3762_s27   ;;  %s179_s8 = sadd.s32 1, %s3758_s26 }
   0x5   : > { %s176_s9 = ssub.s32 %s3762_s27, %s3833_s30  ;;  %p189_p0 = scmp.ne.s32.totalorder %s3758_s26, %s3754_s25 }
   0x6   : > { %p177_p1 = scmp.eq.s32.totalorder %s176_s9, 0  ;;  %p190_p2 = scmp.eq.s32.totalorder %s3829_s28, 1 }
   0x7   : > { %p195_p3 = scmp.ne.s32.totalorder %s3754_s25, %s3750_s24  ;;  %p196_p4 = scmp.eq.s32.totalorder %s2840_s29, 1 }
   0x8   : > { %s3844_s10 = scalar_select %p177_p1, %s3758_s26, %s179_s8  }
   0x9   : > { %p3846_p5 = por %p190_p2, %p189_p0  ;;  %p3850_p6 = por %p196_p4, %p195_p3 }
   0xa   : > { %p2843_p7 = scmp.ge.s32.totalorder %s3762_s27, 1  ;;  %p240_p8 = scmp.lt.s32.totalorder %s3762_s27, 3 }
   0xc   : > { %p241_p9 = pnand %p2843_p7, %p240_p8 }
   0xe   : > { %244 = sbr.rel (%p241_p9) target bundleno = 660 (0x294), region = 48 }
  0x13   : > { %v2846_v0 = vld [vmem:[%s4796_s1 + $0x4] sm:$0xf]  ;;  %vm353_vm0 = vcmask 1043456   ;;  %v333_v1 = vld [vmem:[%s4796_s1] sm:$0xf]  ;;  %p272_p10 = scmp.lt.s32.totalorder %s3829_s28, 1 }
  0x14   : > { %3577 = vmatprep.subr.msk.bf16.mxu0 %vm353_vm0, %v2846_v0  ;;  %v355_v2 = vsel %vm353_vm0, %v2846_v0, 0  ;;  %3578 = vmatprep.subr.msk.bf16.mxu1 %vm353_vm0, %v333_v1  ;;  %v435_v3 = vsel %vm353_vm0, %v333_v1, 0  ;;  %v2855_v4 = vld [vmem:[%s4796_s1 + $0x8] sm:$0xf]  ;;  %v2860_v5 = vld [vmem:[%s4796_s1 + $0xc] sm:$0xf] }
  0x15   : > { %3262 = vmatpush3.bf16.msra.mxu0 %v355_v2  ;;  %3272 = vmatpush3.bf16.msra.mxu1 %v435_v3  ;;  %s273_s19 = scalar_select %p272_p10, %s3829_s28, 1  ;;  %vm340_vm1 = vcmask 64512   ;;  %v2865_v9 = vld [vmem:[%s4796_s1 + $0x10] sm:$0xf]  ;;  %v2870_v14 = vld [vmem:[%s4796_s1 + $0x14] sm:$0xf] }
  0x16   : > { %3579 = vmatprep.subr.msk.bf16.mxu0 %vm353_vm0, %v2855_v4  ;;  %3580 = vmatprep.subr.msk.bf16.mxu1 %vm353_vm0, %v2860_v5  ;;  %v570_v19 = vsel %vm353_vm0, %v2855_v4, 0  ;;  %v664_v23 = vsel %vm353_vm0, %v2860_v5, 0  ;;  %v3922_v24 = vld [vmem:[%s4796_s1 + $0x18] sm:$0xf]  ;;  %v3937_v31 = vld [vmem:[%s4796_s1 + $0x1c] sm:$0xf] }
  0x17   : > { %s3587_s22 = smul.u32 576, %s273_s19  ;;  %vm518_vm2 = vcmask 1046528   ;;  %v3952_v36 = vsel %vm353_vm0, %v2865_v9, 0  ;;  %v3961_v40 = vsel %vm353_vm0, %v2870_v14, 0  ;;  %v3966_v41 = vld [vmem:[%s4796_s1 + $0x20] sm:$0xf] }
  0x18   : > { %v3979_v47 = vsel %vm353_vm0, %v3922_v24, 0  ;;  %v3998_v58 = vsel %vm353_vm0, %v3937_v31, 0  ;;  %v4002_v59 = vsel %vm353_vm0, %v3966_v41, 0  ;;  %s269_s18 = sand.u32 1, %s3754_s25   ;;  %s3102_s23 = sshll.u32 %s3829_s28, 10 }
  0x19   : > { %s3879_s8 = scalar_lea.vmem %s4795_s0, %s3587_s22  ;;  %s2844_s21 = sshll.u32 %s269_s18, 6 }
  0x1a   : > { %v296_v6 = vld [vmem:[%s3879_s8 + $0x90] sm:$0xff]  ;;  %v3883_v7 = vld [vmem:[%s3879_s8 + $0xa0] sm:$0xff]  ;;  %v279_v16 = vld [vmem:[%s3879_s8 + $0x8] sm:$0x1]  ;;  %s4724_s22 = scalar_lea.vmem [#allocation3], %s2844_s21  ;;  %s4747_s13 = scalar_lea.hbm %s4802_s7, %s3102_s23 }
  0x1b   : > { %v3886_v8 = vld [vmem:[%s3879_s8 + $0xb0] sm:$0xff]  ;;  %v3892_v10 = vld [vmem:[%s3879_s8 + $0xc0] sm:$0xff]  ;;  %v334_v12 = vpack.c.bf16 %v3883_v7, %v296_v6  ;;  %v283_v20 = vld [vmem:[%s3879_s8 + $0x28] sm:$0x1]  ;;  %v520_v26 = vrot.slane %v279_v16, 1  ;;  %s2778_s29 = sshll.u32 %s4724_s22, 4  ;;  %s4749_s29 = int_to_ptr.vmem [resolvable:$true] %s2778_s29 }
  0x1c   : > { %v3895_v11 = vld [vmem:[%s3879_s8 + $0xd0] sm:$0xff]  ;;  %v278_v13 = vld [vmem:[%s3879_s8] sm:$0xff]  ;;  %v335_v15 = vpack.c.bf16 %v3892_v10, %v3886_v8  ;;  %v285_v27 = vld [vmem:[%s3879_s8 + $0x38] sm:$0x1]  ;;  %v526_v43 = vrot.slane %v283_v20, 1  ;;  %s4755_s14 = scalar_lea.sflag [#allocation4], %s269_s18 }
  0x1d   : > { %v3906_v17 = vld [vmem:[%s3879_s8 + $0x10] sm:$0xff]  ;;  %v3909_v18 = vld [vmem:[%s3879_s8 + $0x20] sm:$0xff]  ;;  %3263 = vmatprep.mubr.msk.bf16.mxu0 %vm340_vm1, %v334_v12  ;;  %v519_v25 = vrot.slane %v278_v13, 1  ;;  %v281_v39 = vld [vmem:[%s3879_s8 + $0x18] sm:$0x1]  ;;  %v529_v49 = vrot.slane %v285_v27, 1 }
  0x1e   : > { %v329_v21 = vpack.c.bf16 %v3906_v17, %v278_v13  ;;  %v3916_v22 = vld [vmem:[%s3879_s8 + $0x30] sm:$0xff]  ;;  %3264 = vmatmul.mubr.msk.bf16.vlgmr.msra.gmra.mxu0 %vm340_vm1, %v335_v15  ;;  %v3929_v29 = vld [vmem:[%s3879_s8 + $0xe0] sm:$0xff]  ;;  %v522_v37 = vrot.slane %v3906_v17, 1  ;;  %v525_v42 = vrot.slane %v3909_v18, 1  ;;  %v523_v51 = vrot.slane %v281_v39, 1  ;;  %s3702_s28 = scalar_lea.vmem %s4749_s29, 1024 }
  0x1f   : > { %v330_v28 = vpack.c.bf16 %v3916_v22, %v3909_v18  ;;  %v3932_v30 = vld [vmem:[%s3879_s8 + $0x40] sm:$0xff]  ;;  %3282 = vmatpush3.bf16.msra.mxu0 %v570_v19  ;;  %v336_v32 = vpack.c.bf16 %v3929_v29, %v3895_v11  ;;  %v3943_v33 = vld [vmem:[%s3879_s8 + $0x50] sm:$0xff]  ;;  %v528_v44 = vrot.slane %v3916_v22, 1  ;;  %v521_v48 = vsel %vm518_vm2, %v519_v25, %v520_v26  ;;  %v287_v54 = vld [vmem:[%s3879_s8 + $0x48] sm:$0x1]  ;;  %p3703_p11 = scmp.ne.s32.totalorder %s4749_s29, %s3702_s28  ;;  %s3765_s15 = smov [#allocation3]  }
  0x20   : > { %3273 = vmatprep.mubr.msk.bf16.mxu1 %vm340_vm1, %v329_v21  ;;  %v3946_v34 = vld [vmem:[%s3879_s8 + $0xf0] sm:$0xff]  ;;  %v3949_v35 = vld [vmem:[%s3879_s8 + $0x100] sm:$0xff]  ;;  %v331_v38 = vpack.c.bf16 %v3943_v33, %v3932_v30  ;;  %3581 = vmatprep.subr.msk.bf16.mxu0 %vm353_vm0, %v2865_v9  ;;  %v531_v55 = vrot.slane %v3932_v30, 1  ;;  %v534_v56 = vrot.slane %v3943_v33, 1  ;;  %v289_v57 = vld [vmem:[%s3879_s8 + $0x58] sm:$0x1]  ;;  %v4007_v61 = vsel %vm518_vm2, %v522_v37, %v523_v51 }
  0x21   : > { %3274 = vmatmul.mubr.msk.bf16.vlgmr.msra.gmra.mxu1 %vm340_vm1, %v330_v28  ;;  %3267 = vmatprep.mubr.msk.bf16.mxu0 %vm340_vm1, %v336_v32  ;;  %v3972_v45 = vld [vmem:[%s3879_s8 + $0x60] sm:$0xff]  ;;  %v3975_v46 = vld [vmem:[%s3879_s8 + $0x70] sm:$0xff]  ;;  %v337_v50 = vpack.c.bf16 %v3949_v35, %v3946_v34  ;;  %v532_v62 = vrot.slane %v287_v54, 1  ;;  %v535_v63 = vrot.slane %v289_v57, 1  ;;  %v551_v2 = vpack.c.bf16 %v4007_v61, %v521_v48  ;;  %v293_v15 = vld [vmem:[%s3879_s8 + $0x78] sm:$0x1]  ;;  %p3704_p12 = pnand %p3703_p11, %p3846_p5 }
  0x22   : > { %3292 = vmatpush3.bf16.msra.mxu1 %v664_v23  ;;  %3277 = vmatprep.mubr.msk.bf16.mxu1 %vm340_vm1, %v331_v38  ;;  %v3986_v52 = vld [vmem:[%s3879_s8 + $0x120] sm:$0xff]  ;;  %v3989_v53 = vld [vmem:[%s3879_s8 + $0x130] sm:$0xff]  ;;  %v332_v60 = vpack.c.bf16 %v3975_v46, %v3972_v45  ;;  %v537_v0 = vrot.slane %v3972_v45, 1  ;;  %v540_v1 = vrot.slane %v3975_v46, 1  ;;  %v4021_v6 = vsel %vm518_vm2, %v525_v42, %v526_v43  ;;  %v306_v27 = vld [vmem:[%s3879_s8 + $0x128] sm:$0x1] }
  0x23   : > { %3582 = vmatprep.subr.msk.bf16.mxu1 %vm353_vm0, %v2870_v14  ;;  %v645_v3 = vpack.c.bf16 %v3989_v53, %v3986_v52  ;;  %v4015_v4 = vld [vmem:[%s3879_s8 + $0x140] sm:$0xff]  ;;  %v4018_v5 = vld [vmem:[%s3879_s8 + $0x150] sm:$0xff]  ;;  %v4024_v9 = vsel %vm518_vm2, %v528_v44, %v529_v49  ;;  %v849_v12 = vrot.slane %v3986_v52, 1  ;;  %v852_v13 = vrot.slane %v3989_v53, 1  ;;  %v291_v14 = vld [vmem:[%s3879_s8 + $0x68] sm:$0x1]  ;;  %p3705_p13 = pneg %p3704_p12 }
  0x24   : > { %v4032_v16 = vld [vmem:[%s3879_s8 + $0x160] sm:$0xff]  ;;  %v855_v19 = vrot.slane %v4015_v4, 1  ;;  %v4038_v21 = vsel %vm518_vm2, %v531_v55, %v532_v62  ;;  %v4041_v23 = vsel %vm518_vm2, %v534_v56, %v535_v63  ;;  %v4044_v25 = vld [vmem:[%s3879_s8 + $0x170] sm:$0xff]  ;;  %v308_v28 = vld [vmem:[%s3879_s8 + $0x138] sm:$0x1]  ;;  %v552_v38 = vpack.c.bf16 %v4024_v9, %v4021_v6  ;;  %s3706_s16 = sshll.u32 %s3765_s15, 4  ;;  %s3707_s16 = int_to_ptr.vmem [resolvable:$false] %s3706_s16 }
  0x25   : > { %v4047_v26 = vld [vmem:[%s3879_s8 + $0x180] sm:$0xff]  ;;  %v310_v32 = vld [vmem:[%s3879_s8 + $0x148] sm:$0x1]  ;;  %v312_v37 = vld [vmem:[%s3879_s8 + $0x158] sm:$0x1]  ;;  %v538_v39 = vrot.slane %v291_v14, 1  ;;  %v553_v49 = vpack.c.bf16 %v4041_v23, %v4038_v21  ;;  %v646_v62 = vpack.c.bf16 %v4018_v5, %v4015_v4  ;;  %v647_v14 = vpack.c.bf16 %v4044_v25, %v4032_v16  ;;  %p3709_p0 = scmp.lt.s32.totalorder %s4749_s29, %s3707_s16 }
  0x26   : > { %3268 = vmatmul.mubr.msk.bf16.gmra.mxu0 %vm340_vm1, %v337_v50  ;;  %v541_v42 = vrot.slane %v293_v15, 1  ;;  %v861_v43 = vrot.slane %v4032_v16, 1  ;;  %v4059_v44 = vld [vmem:[%s3879_s8 + $0x190] sm:$0xff]  ;;  %v314_v48 = vld [vmem:[%s3879_s8 + $0x168] sm:$0x1]  ;;  %v864_v50 = vrot.slane %v4044_v25, 1 }
  0x27   : > { %3283 = vmatprep.mubr.msk.bf16.mxu0 %vm340_vm1, %v551_v2  ;;  %v867_v51 = vrot.slane %v4047_v26, 1  ;;  %v870_v52 = vrot.slane %v4059_v44, 1  ;;  %v316_v53 = vld [vmem:[%s3879_s8 + $0x178] sm:$0x1]  ;;  %v850_v54 = vrot.slane %v306_v27, 1  ;;  %v853_v55 = vrot.slane %v308_v28, 1 }
  0x28   : > { %v856_v56 = vrot.slane %v310_v32, 1  ;;  %v859_v57 = vrot.slane %v312_v37, 1  ;;  %v862_v63 = vrot.slane %v314_v48, 1  ;;  %v865_v2 = vrot.slane %v316_v53, 1  ;;  %v4075_v15 = vld [vmem:[%s3879_s8 + $0x80] sm:$0xff]  ;;  %v321_v27 = vld [vmem:[%s3879_s8 + $0x1b0] sm:$0xff] }
  0x29   : > { %3278 = vmatmul.mubr.msk.bf16.gmra.mxu1 %vm340_vm1, %v332_v60  ;;  %v318_v60 = vld [vmem:[%s3879_s8 + $0x188] sm:$0x1]  ;;  %v322_v28 = vld [vmem:[%s3879_s8 + $0x1c0] sm:$0xff]  ;;  %v4086_v32 = vsel %vm518_vm2, %v537_v0, %v538_v39  ;;  %v4089_v37 = vsel %vm518_vm2, %v540_v1, %v541_v42  ;;  %v851_v1 = vsel %vm518_vm2, %v849_v12, %v850_v54  ;;  %v854_v39 = vsel %vm518_vm2, %v852_v13, %v853_v55  ;;  %v323_v48 = vld [vmem:[%s3879_s8 + $0x1d0] sm:$0xff]  ;;  %s3708_s17 = scalar_lea.vmem %s3707_s16, 2048 }
  0x2a   : > { %3293 = vmatprep.mubr.msk.bf16.mxu1 %vm340_vm1, %v645_v3  ;;  %v320_v3 = vld [vmem:[%s3879_s8 + $0x198] sm:$0x1]  ;;  %v4078_v20 = vld [vmem:[%s3879_s8 + $0x88] sm:$0x1]  ;;  %v868_v16 = vrot.slane %v318_v60, 1  ;;  %v554_v0 = vpack.c.bf16 %v4089_v37, %v4086_v32  ;;  %v648_v42 = vpack.c.bf16 %v4059_v44, %v4047_v26  ;;  %v325_v53 = vld [vmem:[%s3879_s8 + $0x1f0] sm:$0xff]  ;;  %v863_v44 = vsel %vm518_vm2, %v861_v43, %v862_v63  ;;  %p3710_p1 = scmp.lt.s32.totalorder %s3708_s17, %s3702_s28 }
  0x2b   : > { %v871_v25 = vrot.slane %v320_v3, 1  ;;  %v326_v60 = vld [vmem:[%s3879_s8 + $0x200] sm:$0xff]  ;;  %v4814_v12 = vrot.slane %v4018_v5, 1  ;;  %v866_v54 = vsel %vm518_vm2, %v864_v50, %v865_v2  ;;  %v327_v3 = vld [vmem:[%s3879_s8 + $0x210] sm:$0xff]  ;;  %v1069_v50 = vpack.c.bf16 %v3886_v8, %v3883_v7  ;;  %v3643_v63 = vld [vmem:[%s4798_s3 + $0x8] sm:$0xff]  }
  0x2c   : > { %v4127_v55 = vpack.c.bf16 %v326_v60, %v325_v53  ;;  %v869_v4 = vsel %vm518_vm2, %v867_v51, %v868_v16  ;;  %v1071_v7 = vpack.c.bf16 %v3946_v34, %v3929_v29  ;;  %v304_v8 = vld [vmem:[%s3879_s8 + $0x110] sm:$0xff]  ;;  %v1171_v29 = vpack.c.bf16 %v4086_v32, %v4041_v23  ;;  %v3630_v34 = vld [vmem:[%s4798_s3 + $0x78] sm:$0xff]   ;;  %p3711_p2 = por %p3710_p1, %p3709_p0 }
  0x2d   : > { %v860_v13 = vsel %vm518_vm2, %v4814_v12, %v859_v57  ;;  %v872_v5 = vsel %vm518_vm2, %v870_v52, %v871_v25  ;;  %v4803_v23 = vmov 0.0   ;;  %v3639_v51 = vld [vmem:[%s4798_s3 + $0x18] sm:$0xff]   ;;  %v3642_v52 = vld [vmem:[%s4798_s3 + $0x48] sm:$0xff]   ;;  %v3644_v57 = vld [vmem:[%s4798_s3 + $0x40] sm:$0xff]  }
  0x2e   : > { %3284 = vmatmul.mubr.msk.bf16.vlgmr.msra.gmra.mxu0 %vm340_vm1, %v552_v38  ;;  %v1166_v38 = vrot.slane %v4078_v20, 1  ;;  %4816 = vst [vmem:[#allocation8_spill] sm:$0xff] %v4127_v55  ;;  %v884_v43 = vpack.c.bf16 %v872_v5, %v869_v4  ;;  %v3637_v20 = vld [vmem:[%s4798_s3 + $0x20] sm:$0xff]   ;;  %1292 = vst [vmem:[#allocation2 + $0x30] sm:$0xff] %v4803_v23  ;;  %v4257_v2 = vld [vmem:[%s4798_s3 + $0xb8] sm:$0xff]   ;;  %p3712_p3 = pnand %p3711_p2, %p3705_p13 }
  0x2f   : > { %3302 = vmatpush3.bf16.msra.mxu0 %v3952_v36  ;;  %3287 = vmatprep.mubr.msk.bf16.mxu0 %vm340_vm1, %v553_v49  ;;  %v1165_v36 = vrot.slane %v4075_v15, 1  ;;  %v324_v49 = vld [vmem:[%s3879_s8 + $0x1e0] sm:$0xff]  ;;  %1293 = vst [vmem:[#allocation2 + $0x38] sm:$0x3] %v4803_v23  ;;  %1286 = vst [vmem:[#allocation2] sm:$0xff] %v4803_v23 }
  0x30   : > { %3583 = vmatprep.subr.msk.bf16.mxu0 %vm353_vm0, %v3922_v24  ;;  %v4104_v24 = vpack.c.bf16 %v322_v28, %v321_v27  ;;  %v4123_v26 = vpack.c.bf16 %v324_v49, %v323_v48  ;;  %v883_v27 = vpack.c.bf16 %v866_v54, %v863_v44  ;;  %1287 = vst [vmem:[#allocation2 + $0x8] sm:$0x3] %v4803_v23  ;;  %1288 = vst [vmem:[#allocation2 + $0x10] sm:$0xff] %v4803_v23  ;;  %v4266_v28 = vld [vmem:[%s4798_s3 + $0xf8] sm:$0xff]  }
  0x31   : > { %3294 = vmatmul.mubr.msk.bf16.vlgmr.msra.gmra.mxu1 %vm340_vm1, %v646_v62  ;;  %1289 = vst [vmem:[#allocation2 + $0x18] sm:$0x3] %v4803_v23  ;;  %1290 = vst [vmem:[#allocation2 + $0x20] sm:$0xff] %v4803_v23 }
  0x32   : > { %3297 = vmatprep.mubr.msk.bf16.mxu1 %vm340_vm1, %v647_v14  ;;  %3312 = vmatpush3.bf16.msra.mxu1 %v3961_v40  ;;  %4813 = vst [vmem:[#allocation6_spill] sm:$0xff] %v4104_v24  ;;  %v881_v40 = vpack.c.bf16 %v854_v39, %v851_v1  ;;  %4815 = vst [vmem:[#allocation7_spill] sm:$0xff] %v4123_v26  ;;  %v328_v14 = vld [vmem:[%s3879_s8 + $0x220] sm:$0xff] }
  0x33   : > { %3584 = vmatprep.subr.msk.bf16.mxu1 %vm353_vm0, %v3937_v31  ;;  %v857_v31 = vsel %vm518_vm2, %v855_v19, %v856_v56  ;;  %v4143_v19 = vpack.c.bf16 %v328_v14, %v327_v3  ;;  %1291 = vst [vmem:[#allocation2 + $0x28] sm:$0x3] %v4803_v23  ;;  %1294 = vst [vmem:[#allocation2 + $0x40] sm:$0xff] %v4803_v23  ;;  %v3641_v56 = vld [vmem:[%s4798_s3 + $0x10] sm:$0xff]  }
  0x34   : > { %v882_v62 = vpack.c.bf16 %v860_v13, %v857_v31  ;;  %1295 = vst [vmem:[#allocation2 + $0x48] sm:$0x3] %v4803_v23  ;;  %1296 = vst [vmem:[#allocation2 + $0x50] sm:$0xff] %v4803_v23 }
  0x35   : > { %4817 = vst [vmem:[#allocation9_spill] sm:$0xff] %v4143_v19  ;;  %1297 = vst [vmem:[#allocation2 + $0x58] sm:$0x3] %v4803_v23 }
  0x36   : > { %3288 = vmatmul.mubr.msk.bf16.gmra.mxu0 %vm340_vm1, %v554_v0  ;;  %1298 = vst [vmem:[#allocation2 + $0x60] sm:$0xff] %v4803_v23  ;;  %1299 = vst [vmem:[#allocation2 + $0x68] sm:$0x3] %v4803_v23 }
  0x37   : > { %3303 = vmatprep.mubr.msk.bf16.mxu0 %vm340_vm1, %v4104_v24  ;;  %1300 = vst [vmem:[#allocation2 + $0x70] sm:$0xff] %v4803_v23  ;;  %1301 = vst [vmem:[#allocation2 + $0x78] sm:$0x3] %v4803_v23 }
  0x38   : > { %1302 = vst [vmem:[#allocation2 + $0x80] sm:$0xff] %v4803_v23  ;;  %1303 = vst [vmem:[#allocation2 + $0x88] sm:$0x3] %v4803_v23 }
  0x39   : > { %3298 = vmatmul.mubr.msk.bf16.gmra.mxu1 %vm340_vm1, %v648_v42  ;;  %1304 = vst [vmem:[#allocation2 + $0x90] sm:$0xff] %v4803_v23  ;;  %1305 = vst [vmem:[#allocation2 + $0x98] sm:$0x3] %v4803_v23 }
  0x3a   : > { %3313 = vmatprep.mubr.msk.bf16.mxu1 %vm340_vm1, %v881_v40  ;;  %4818 = vst [vmem:[#allocation10_spill] sm:$0xff] %v4257_v2  ;;  %4819 = vst [vmem:[#allocation11_spill] sm:$0xff] %v4266_v28 }
  0x3e   : > { %3304 = vmatmul.mubr.msk.bf16.vlgmr.msra.gmra.mxu0 %vm340_vm1, %v4123_v26 }
  0x3f   : > { %3322 = vmatpush3.bf16.msra.mxu0 %v3979_v47  ;;  %3307 = vmatprep.mubr.msk.bf16.mxu0 %vm340_vm1, %v4127_v55  ;;  %v975_v47 = vpack.c.bf16 %v3909_v18, %v3906_v17  ;;  %v1070_v17 = vpack.c.bf16 %v3895_v11, %v3892_v10  ;;  %v978_v18 = vpack.c.bf16 %v4075_v15, %v3975_v46  ;;  %v3634_v46 = vld [vmem:[%s4798_s3 + $0x68] sm:$0xff]   ;;  %v3645_v15 = vld [vmem:[%s4798_s3] sm:$0xff]  }
  0x40   : > { %3585 = vmatprep.subr.msk.bf16.mxu0 %vm353_vm0, %v3966_v41  ;;  %v976_v41 = vpack.c.bf16 %v3932_v30, %v3916_v22  ;;  %v1169_v10 = vpack.c.bf16 %v4021_v6, %v4007_v61  ;;  %v1072_v11 = vpack.c.bf16 %v304_v8, %v3949_v35  ;;  %v1170_v22 = vpack.c.bf16 %v4038_v21, %v4024_v9  ;;  %v3632_v35 = vld [vmem:[%s4798_s3 + $0x70] sm:$0xff]   ;;  %v3636_v61 = vld [vmem:[%s4798_s3 + $0x60] sm:$0xff]   ;;  %v3635_v6 = vld [vmem:[%s4798_s3 + $0x28] sm:$0xff]  }
  0x41   : > { %3314 = vmatmul.mubr.msk.bf16.vlgmr.msra.gmra.mxu1 %vm340_vm1, %v882_v62  ;;  %v1167_v30 = vsel %vm518_vm2, %v1165_v36, %v1166_v38  ;;  %v3638_v9 = vld [vmem:[%s4798_s3 + $0x58] sm:$0xff]   ;;  %v3640_v21 = vld [vmem:[%s4798_s3 + $0x50] sm:$0xff]  }
  0x42   : > { %3317 = vmatprep.mubr.msk.bf16.mxu1 %vm340_vm1, %v883_v27  ;;  %3332 = vmatpush3.bf16.msra.mxu1 %v3998_v58  ;;  %v977_v58 = vpack.c.bf16 %v3972_v45, %v3943_v33  ;;  %v1172_v33 = vpack.c.bf16 %v1167_v30, %v4089_v37  ;;  %v3631_v45 = vld [vmem:[%s4798_s3 + $0x38] sm:$0xff]  }
  0x43   : > { %3351 = vmatprep.subr.bf16.mxu1 %v3630_v34 }
  0x46   : > { %3308 = vmatmul.mubr.msk.bf16.gmra.mxu0 %vm340_vm1, %v4143_v19 }
  0x47   : > { %3323 = vmatprep.mubr.msk.bf16.mxu0 %vm340_vm1, %v975_v47 }
  0x49   : > { %3318 = vmatmul.mubr.msk.bf16.gmra.mxu1 %vm340_vm1, %v884_v43 }
  0x4a   : > { %3333 = vmatprep.mubr.msk.bf16.mxu1 %vm340_vm1, %v1069_v50 }
  0x4e   : > { %3324 = vmatmul.mubr.msk.bf16.vlgmr.msra.gmra.mxu0 %vm340_vm1, %v976_v41 }
  0x4f   : > { %3342 = vmatpush3.bf16.msra.mxu0 %v4002_v59  ;;  %3327 = vmatprep.mubr.msk.bf16.mxu0 %vm340_vm1, %v977_v58  ;;  %v3633_v59 = vld [vmem:[%s4798_s3 + $0x30] sm:$0xff]  }
  0x50   : > { %3375 = vmatprep.subr.bf16.mxu0 %v3631_v45 }
  0x51   : > { %3334 = vmatmul.mubr.msk.bf16.vlgmr.msra.gmra.mxu1 %vm340_vm1, %v1070_v17 }
  0x52   : > { %3337 = vmatprep.mubr.msk.bf16.mxu1 %vm340_vm1, %v1071_v7  ;;  %3352 = vmatpush3.bf16.msra.mxu1 %v3630_v34 }
  0x53   : > { %3353 = vmatprep.subr.bf16.mxu1 %v3632_v35 }
  0x56   : > { %3328 = vmatmul.mubr.msk.bf16.gmra.mxu0 %vm340_vm1, %v978_v18  ;;  %3354 = vmatpush3.bf16.msra.mxu1 %v3632_v35 }
  0x57   : > { %3343 = vmatprep.mubr.msk.bf16.mxu0 %vm340_vm1, %v1169_v10  ;;  %3355 = vmatprep.subr.bf16.mxu1 %v3634_v46 }
  0x59   : > { %3338 = vmatmul.mubr.msk.bf16.gmra.mxu1 %vm340_vm1, %v1072_v11 }
  0x5a   : > { %3356 = vmatpush3.bf16.msra.mxu1 %v3634_v46 }
  0x5b   : > { %3357 = vmatprep.subr.bf16.mxu1 %v3636_v61 }
  0x5e   : > { %3344 = vmatmul.mubr.msk.bf16.vlgmr.msra.gmra.mxu0 %vm340_vm1, %v1170_v22  ;;  %3358 = vmatpush3.bf16.msra.mxu1 %v3636_v61 }
  0x5f   : > { %3347 = vmatprep.mubr.msk.bf16.mxu0 %vm340_vm1, %v1171_v29  ;;  %3376 = vmatpush3.bf16.msra.mxu0 %v3631_v45 }
  0x60   : > { %3377 = vmatprep.subr.bf16.mxu0 %v3633_v59  ;;  %3359 = vmatprep.subr.bf16.mxu1 %v3638_v9 }
  0x62   : > { %3360 = vmatpush3.bf16.msra.mxu1 %v3638_v9 }
  0x63   : > { %3378 = vmatpush3.bf16.msra.mxu0 %v3633_v59  ;;  %3361 = vmatprep.subr.bf16.mxu1 %v3640_v21 }
  0x64   : > { %3379 = vmatprep.subr.bf16.mxu0 %v3635_v6 }
  0x66   : > { %3348 = vmatmul.mubr.msk.bf16.gmra.mxu0 %vm340_vm1, %v1172_v33  ;;  %3362 = vmatpush3.bf16.msra.mxu1 %v3640_v21 }
  0x67   : > { %3380 = vmatpush3.bf16.msra.mxu0 %v3635_v6  ;;  %3363 = vmatprep.subr.bf16.mxu1 %v3642_v52 }
  0x68   : > { %3381 = vmatprep.subr.bf16.mxu0 %v3637_v20 }
  0x6a   : > { %3364 = vmatpush3.bf16.msra.mxu1 %v3642_v52 }
  0x6b   : > { %3382 = vmatpush3.bf16.msra.mxu0 %v3637_v20  ;;  %3365 = vmatprep.subr.bf16.mxu1 %v3644_v57 }
  0x6c   : > { %3383 = vmatprep.subr.bf16.mxu0 %v3639_v51 }
  0x6e   : > { %3366 = vmatpush3.bf16.msra.mxu1 %v3644_v57 }
  0x6f   : > { %3384 = vmatpush3.bf16.msra.mxu0 %v3639_v51  ;;  %3399 = vmatprep.subr.bf16.mxu1 %v4257_v2 }
  0x70   : > { %3385 = vmatprep.subr.bf16.mxu0 %v3641_v56 }
  0x73   : > { %3386 = vmatpush3.bf16.msra.mxu0 %v3641_v56 }
  0x74   : > { %3387 = vmatprep.subr.bf16.mxu0 %v3643_v63 }
  0x77   : > { %3388 = vmatpush3.bf16.msra.mxu0 %v3643_v63 }
  0x78   : > { %3389 = vmatprep.subr.bf16.mxu0 %v3645_v15 }
  0x7b   : > { %3390 = vmatpush3.bf16.msra.mxu0 %v3645_v15 }
  0x7c   : > { %3423 = vmatprep.subr.bf16.mxu0 %v4266_v28 }
  0xde   : > { %v3265_v32 = vpop.f32.mrf.mxu0 }
  0xe0   : > { %v391_v16 = vpop.f32.mrf.mxu0 }
  0xe1   : > { %v3275_v37 = vpop.f32.mrf.mxu1 }
  0xe2   : > { %v3266_v36 = vpop.f32.mrf.mxu0  ;;  %v480_v59 = vadd.f32 %v3275_v37, %v3265_v32 }
  0xe3   : > { %v471_v25 = vpop.f32.mrf.mxu1 }
  0xe4   : > { %v394_v0 = vpop.f32.mrf.mxu0  ;;  %v472_v9 = vadd.f32 %v471_v25, %v391_v16 }
  0xe5   : > { %v3276_v38 = vpop.f32.mrf.mxu1 }
  0xe6   : > { %v3269_v39 = vpop.f32.mrf.mxu0  ;;  %v483_v52 = vadd.f32 %v3276_v38, %v3266_v36 }
  0xe7   : > { %v474_v1 = vpop.f32.mrf.mxu1 }
  0xe8   : > { %v407_v48 = vpop.f32.mrf.mxu0  ;;  %v475_v15 = vadd.f32 %v474_v1, %v394_v0 }
  0xe9   : > { %v3279_v42 = vpop.f32.mrf.mxu1 }
  0xea   : > { %v3270_v40 = vpop.f32.mrf.mxu0  ;;  %v496_v24 = vadd.f32 %v3279_v42, %v3269_v39 }
  0xeb   : > { %v487_v49 = vpop.f32.mrf.mxu1 }
  0xec   : > { %v4269_v60 = vpop.f32.mrf.mxu0  ;;  %v488_v2 = vadd.f32 %v487_v49, %v407_v48 }
  0xed   : > { %v3280_v53 = vpop.f32.mrf.mxu1 }
  0xee   : > { %v3285_v12 = vpop.f32.mrf.mxu0 }
  0xef   : > { %v4271_v31 = vpop.f32.mrf.mxu1  ;;  %v639_v20 = vadd.f32 %v3285_v12, %v480_v59 }
  0xf0   : > { %v606_v13 = vpop.f32.mrf.mxu0 }
  0xf1   : > { %v3295_v44 = vpop.f32.mrf.mxu1  ;;  %v637_v56 = vadd.f32 %v606_v13, %v472_v9 }
  0xf2   : > { %v3286_v54 = vpop.f32.mrf.mxu0  ;;  %v733_v23 = vadd.f32 %v3295_v44, %v639_v20  ;;  %v491_v44 = vadd.f32 %v4271_v31, %v4269_v60 }
  0xf3   : > { %v700_v62 = vpop.f32.mrf.mxu1  ;;  %v640_v19 = vadd.f32 %v3286_v54, %v483_v52 }
  0xf4   : > { %v609_v3 = vpop.f32.mrf.mxu0  ;;  %v731_v28 = vadd.f32 %v700_v62, %v637_v56 }
  0xf5   : > { %v3296_v14 = vpop.f32.mrf.mxu1  ;;  %v638_v32 = vadd.f32 %v609_v3, %v475_v15 }
  0xf6   : > { %v3289_v27 = vpop.f32.mrf.mxu0  ;;  %v734_v25 = vadd.f32 %v3296_v14, %v640_v19 }
  0xf7   : > { %v703_v4 = vpop.f32.mrf.mxu1  ;;  %v643_v12 = vadd.f32 %v3289_v27, %v496_v24 }
  0xf8   : > { %v622_v5 = vpop.f32.mrf.mxu0  ;;  %v732_v13 = vadd.f32 %v703_v4, %v638_v32 }
  0xf9   : > { %v3299_v47 = vpop.f32.mrf.mxu1  ;;  %v641_v36 = vadd.f32 %v622_v5, %v488_v2 }
  0xfa   : > { %v3290_v43 = vpop.f32.mrf.mxu0  ;;  %v737_v54 = vadd.f32 %v3299_v47, %v643_v12 }
  0xfb   : > { %v716_v50 = vpop.f32.mrf.mxu1 }
  0xfc   : > { %v625_v41 = vpop.f32.mrf.mxu0  ;;  %v735_v62 = vadd.f32 %v716_v50, %v641_v36 }
  0xfd   : > { %v3300_v58 = vpop.f32.mrf.mxu1  ;;  %v642_v19 = vadd.f32 %v625_v41, %v491_v44 }
  0xfe   : > { %v3305_v7 = vpop.f32.mrf.mxu0 }
  0xff   : > { %v4273_v17 = vpop.f32.mrf.mxu1  ;;  %v827_v37 = vadd.f32 %v3305_v7, %v733_v23 }
 0x100   : > { %v794_v8 = vpop.f32.mrf.mxu0  ;;  %v736_v60 = vadd.f32 %v4273_v17, %v642_v19 }
 0x101   : > { %v3315_v18 = vpop.f32.mrf.mxu1  ;;  %v825_v59 = vadd.f32 %v794_v8, %v731_v28 }
 0x102   : > { %v3306_v10 = vpop.f32.mrf.mxu0  ;;  %v969_v9 = vadd.f32 %v3315_v18, %v827_v37 }
 0x103   : > { %v936_v11 = vpop.f32.mrf.mxu1  ;;  %v828_v0 = vadd.f32 %v3306_v10, %v734_v25 }
 0x104   : > { %v797_v22 = vpop.f32.mrf.mxu0  ;;  %v967_v23 = vadd.f32 %v936_v11, %v825_v59 }
 0x105   : > { %v3316_v29 = vpop.f32.mrf.mxu1  ;;  %v826_v48 = vadd.f32 %v797_v22, %v732_v13 }
 0x106   : > { %v3309_v30 = vpop.f32.mrf.mxu0  ;;  %v970_v28 = vadd.f32 %v3316_v29, %v828_v0 }
 0x107   : > { %v939_v33 = vpop.f32.mrf.mxu1 }
 0x108   : > { %v810_v34 = vpop.f32.mrf.mxu0  ;;  %v968_v4 = vadd.f32 %v939_v33, %v826_v48 }
 0x109   : > { %v3319_v35 = vpop.f32.mrf.mxu1  ;;  %v829_v14 = vadd.f32 %v810_v34, %v735_v62 }
 0x10a   : > { %v3310_v45 = vpop.f32.mrf.mxu0 }
 0x10b   : > { %v4275_v46 = vpop.f32.mrf.mxu1 }
 0x10c   : > { %v813_v61 = vpop.f32.mrf.mxu0 }
 0x10d   : > { %v4277_v6 = vpop.f32.mrf.mxu1  ;;  %v830_v11 = vadd.f32 %v813_v61, %v736_v60 }
 0x10e   : > { %4820 = vst [vmem:[#allocation12_spill] sm:$0xff] %v4277_v6  ;;  %v3325_v51 = vpop.f32.mrf.mxu0 }
 0x10f   : > { %v4279_v21 = vpop.f32.mrf.mxu1  ;;  %v1063_v49 = vadd.f32 %v3325_v51, %v969_v9 }
 0x110   : > { %4821 = vst [vmem:[#allocation13_spill] sm:$0xff] %v4279_v21  ;;  %v1030_v57 = vpop.f32.mrf.mxu0  ;;  %v499_v21 = vadd.f32 %v3280_v53, %v3270_v40  ;;  %v831_v40 = vadd.f32 %v3309_v30, %v737_v54 }
 0x111   : > { %v3335_v63 = vpop.f32.mrf.mxu1  ;;  %v1061_v2 = vadd.f32 %v1030_v57, %v967_v23  ;;  %v1343_v57 = vld [vmem:[#allocation2 + $0x1] sm:$0xff] }
 0x112   : > { %v3326_v55 = vpop.f32.mrf.mxu0  ;;  %v644_v39 = vadd.f32 %v3290_v43, %v499_v21  ;;  %v1157_v5 = vadd.f32 %v3335_v63, %v1063_v49  ;;  %v4287_v43 = vld [vmem:[%s4797_s2] ss:$0 sm:$0xff]  ;;  %v973_v50 = vadd.f32 %v3319_v35, %v831_v40 }
 0x113   : > { %v1124_v26 = vpop.f32.mrf.mxu1  ;;  %v1064_v7 = vadd.f32 %v3326_v55, %v970_v28  ;;  %v3648_v28 = vld [vmem:[%s4798_s3 + $0xb0] sm:$0xff]  }
 0x114   : > { %v1033_v6 = vpop.f32.mrf.mxu0  ;;  %v738_v3 = vadd.f32 %v3300_v58, %v644_v39  ;;  %v1155_v41 = vadd.f32 %v1124_v26, %v1061_v2  ;;  %v971_v58 = vadd.f32 %v4275_v46, %v829_v14 }
 0x115   : > { %v3336_v16 = vpop.f32.mrf.mxu1  ;;  %v1062_v8 = vadd.f32 %v1033_v6, %v968_v4  ;;  %v4822_v33 = vld [vmem:[#allocation12_spill] sm:$0xff] }
 0x116   : > { %v3329_v38 = vpop.f32.mrf.mxu0  ;;  %v832_v31 = vadd.f32 %v3310_v45, %v738_v3  ;;  %v1158_v29 = vadd.f32 %v3336_v16, %v1064_v7  ;;  %v4825_v7 = vmov 0.0  }
 0x117   : > { %v1127_v1 = vpop.f32.mrf.mxu1  ;;  %v1067_v55 = vadd.f32 %v3329_v38, %v973_v50  ;;  %v4823_v52 = vld [vmem:[#allocation13_spill] sm:$0xff] }
 0x118   : > { %v1046_v42 = vpop.f32.mrf.mxu0  ;;  %v974_v34 = vadd.f32 %v4822_v33, %v832_v31  ;;  %v1156_v21 = vadd.f32 %v1127_v1, %v1062_v8  ;;  %v972_v46 = vadd.f32 %v4823_v52, %v830_v11  ;;  %v3649_v11 = vld [vmem:[%s4798_s3 + $0xf0] sm:$0xff]  }
 0x119   : > { %v3339_v53 = vpop.f32.mrf.mxu1  ;;  %v1065_v45 = vadd.f32 %v1046_v42, %v971_v58 }
 0x11a   : > { %v3330_v24 = vpop.f32.mrf.mxu0  ;;  %v1161_v63 = vadd.f32 %v3339_v53, %v1067_v55 }
 0x11b   : > { %v1140_v18 = vpop.f32.mrf.mxu1  ;;  %v1068_v61 = vadd.f32 %v3330_v24, %v974_v34 }
 0x11c   : > { %v1049_v27 = vpop.f32.mrf.mxu0  ;;  %v1159_v16 = vadd.f32 %v1140_v18, %v1065_v45  ;;  %v3651_v45 = vld [vmem:[%s4798_s3 + $0xe8] sm:$0xff]  }
 0x11d   : > { %v3340_v51 = vpop.f32.mrf.mxu1  ;;  %v1066_v25 = vadd.f32 %v1049_v27, %v972_v46  ;;  %v4824_v27 = vld [vmem:[#allocation10_spill] sm:$0xff]  ;;  %v3656_v46 = vld [vmem:[%s4798_s3 + $0x90] sm:$0xff]  }
 0x11e   : > { %v3345_v47 = vpop.f32.mrf.mxu0  ;;  %v1162_v0 = vadd.f32 %v3340_v51, %v1068_v61  ;;  %v3655_v61 = vld [vmem:[%s4798_s3 + $0xd8] sm:$0xff]  }
 0x11f   : > { %v1257_v10 = vadd.f32 %v3345_v47, %v1157_v5  ;;  %v1143_v59 = vpop.f32.mrf.mxu1  ;;  %v3650_v47 = vld [vmem:[%s4798_s3 + $0xa8] sm:$0xff]  }
 0x120   : > { %v1224_v22 = vpop.f32.mrf.mxu0  ;;  %v1160_v23 = vadd.f32 %v1143_v59, %v1066_v25 }
 0x121   : > { %v1272_v17 = vadd.f32 %v4287_v43, %v1257_v10  ;;  %v1255_v30 = vadd.f32 %v1224_v22, %v1155_v41  ;;  %v1598_v41 = vld [vmem:[#allocation2 + $0x2] sm:$0xff] }
 0x122   : > { %v3346_v20 = vpop.f32.mrf.mxu0 }
 0x123   : > { %v4292_v35 = vmax.f32 %v1272_v17, 0.0  ;;  %v1270_v26 = vadd.f32 %v4287_v43, %v1255_v30  ;;  %v1258_v6 = vadd.f32 %v3346_v20, %v1158_v29  ;;  %v3652_v29 = vld [vmem:[%s4798_s3 + $0xa0] sm:$0xff]   ;;  %v4826_v17 = vld [vmem:[#allocation11_spill] sm:$0xff]  ;;  %v3654_v20 = vld [vmem:[%s4798_s3 + $0x98] sm:$0xff]  }
 0x124   : > { %v1227_v56 = vpop.f32.mrf.mxu0 }
 0x125   : > { %1309 = vst [vmem:[#allocation2 + $0x31] sm:$0xff] %v4292_v35  ;;  %v4297_v15 = vmax.f32 %v1270_v26, 0.0  ;;  %v1273_v32 = vadd.f32 %v4287_v43, %v1258_v6  ;;  %v1256_v37 = vadd.f32 %v1227_v56, %v1156_v21  ;;  %v3653_v6 = vld [vmem:[%s4798_s3 + $0xe0] sm:$0xff]   ;;  %v3658_v56 = vld [vmem:[%s4798_s3 + $0x88] sm:$0xff]  }
 0x126   : > { %v3349_v12 = vpop.f32.mrf.mxu0 }
 0x127   : > { %1307 = vst [vmem:[#allocation2 + $0x11] sm:$0xff] %v4297_v15  ;;  %v4301_v36 = vmax.f32 %v1273_v32, 0.0  ;;  %v1271_v38 = vadd.f32 %v4287_v43, %v1256_v37  ;;  %v1261_v13 = vadd.f32 %v3349_v12, %v1161_v63  ;;  %v1351_v9 = vpack.c.bf16 %v4297_v15, %v1343_v57  ;;  %v3657_v57 = vld [vmem:[%s4798_s3 + $0xd0] sm:$0xff]   ;;  %v3660_v63 = vld [vmem:[%s4798_s3 + $0x80] sm:$0xff]   ;;  %v3659_v32 = vld [vmem:[%s4798_s3 + $0xc8] sm:$0xff]  }
 0x128   : > { %v1240_v1 = vpop.f32.mrf.mxu0  ;;  %v3662_v37 = vld [vmem:[%s4798_s3 + $0x138] sm:$0xff]   ;;  %v3661_v12 = vld [vmem:[%s4798_s3 + $0xc0] sm:$0xff]  }
 0x129   : > { %1310 = vst [vmem:[#allocation2 + $0x41] sm:$0xff] %v4301_v36  ;;  %v4306_v44 = vmax.f32 %v1271_v38, 0.0  ;;  %v1276_v39 = vadd.f32 %v4287_v43, %v1261_v13  ;;  %v1259_v42 = vadd.f32 %v1240_v1, %v1159_v16  ;;  %3367 = vmatprep.mubr.bf16.mxu1 %v1351_v9  ;;  %v1907_v54 = vpack.c.bf16 %v4301_v36, %v4292_v35  ;;  %v3663_v1 = vld [vmem:[%s4798_s3 + $0x178] sm:$0xff]  }
 0x12a   : > { %v3350_v48 = vpop.f32.mrf.mxu0 }
 0x12b   : > { %1308 = vst [vmem:[#allocation2 + $0x21] sm:$0xff] %v4306_v44  ;;  %v4312_v49 = vmax.f32 %v1276_v39, 0.0  ;;  %v1274_v62 = vadd.f32 %v4287_v43, %v1259_v42  ;;  %v1262_v19 = vadd.f32 %v3350_v48, %v1162_v0  ;;  %v4317_v24 = vpack.c.bf16 %v4292_v35, %v4306_v44  ;;  %v3664_v0 = vld [vmem:[%s4798_s3 + $0x130] sm:$0xff]   ;;  %v3666_v39 = vld [vmem:[%s4798_s3 + $0x128] sm:$0xff]  }
 0x12c   : > { %v1243_v40 = vpop.f32.mrf.mxu0  ;;  %v4346_v18 = vld [vmem:[#allocation2 + $0x30] sm:$0xff] }
 0x12d   : > { %1313 = vst [vmem:[#allocation2 + $0x71] sm:$0xff] %v4312_v49  ;;  %v4323_v2 = vmax.f32 %v1274_v62, 0.0  ;;  %v1277_v53 = vadd.f32 %v4287_v43, %v1262_v19  ;;  %v1260_v3 = vadd.f32 %v1243_v40, %v1160_v23  ;;  %3368 = vmatmul.mubr.bf16.vlgmr.msra.gmra.mxu1 %v4317_v24  ;;  %v4418_v59 = vld [vmem:[#allocation2 + $0x32] sm:$0xff]  ;;  %v3668_v40 = vld [vmem:[%s4798_s3 + $0x120] sm:$0xff]  }
 0x12e   : > { %v1316_v14 = vld [vmem:[#allocation2 + $0x10] sm:$0xff]  ;;  %3400 = vmatpush3.bf16.msra.mxu1 %v4824_v27  ;;  %v3670_v27 = vld [vmem:[%s4798_s3 + $0x118] sm:$0xff]  }
 0x12f   : > { %1311 = vst [vmem:[#allocation2 + $0x51] sm:$0xff] %v4323_v2  ;;  %v4329_v4 = vmax.f32 %v1277_v53, 0.0  ;;  %v1275_v5 = vadd.f32 %v4287_v43, %v1260_v3  ;;  %v1323_v60 = vpack.c.bf16 %v1316_v14, %v4825_v7  ;;  %3401 = vmatprep.subr.bf16.mxu1 %v3648_v28  ;;  %v4335_v31 = vpack.c.bf16 %v4323_v2, %v4301_v36  ;;  %v4348_v10 = vld [vmem:[#allocation2 + $0x12] sm:$0xff]  ;;  %v3667_v3 = vld [vmem:[%s4798_s3 + $0x168] sm:$0xff]  }
 0x130   : > { %v1606_v55 = vpack.c.bf16 %v4348_v10, %v1598_v41  ;;  %v4368_v30 = vld [vmem:[#allocation2 + $0x40] sm:$0xff]  ;;  %v3665_v48 = vld [vmem:[%s4798_s3 + $0x170] sm:$0xff]   ;;  %v1906_v53 = vpack.c.bf16 %v4306_v44, %v4297_v15  ;;  %v3674_v41 = vld [vmem:[%s4798_s3 + $0x108] sm:$0xff]  }
 0x131   : > { %1314 = vst [vmem:[#allocation2 + $0x81] sm:$0xff] %v4329_v4  ;;  %v4341_v50 = vmax.f32 %v1275_v5, 0.0  ;;  %3391 = vmatprep.mubr.bf16.mxu0 %v1323_v60  ;;  %3371 = vmatprep.mubr.bf16.mxu1 %v4335_v31  ;;  %v1909_v43 = vpack.c.bf16 %v4329_v4, %v4312_v49  ;;  %v4423_v13 = vld [vmem:[#allocation2 + $0x42] sm:$0xff]  ;;  %v1757_v23 = vpack.c.bf16 %v4368_v30, %v4346_v18  ;;  %v3672_v60 = vld [vmem:[%s4798_s3 + $0x110] sm:$0xff]  }
 0x132   : > { %v1317_v8 = vld [vmem:[#allocation2 + $0x20] sm:$0xff]  ;;  %3402 = vmatpush3.bf16.msra.mxu1 %v3648_v28  ;;  %v3681_v35 = vld [vmem:[%s4798_s3 + $0x1f0] sm:$0xff]  }
 0x133   : > { %1312 = vst [vmem:[#allocation2 + $0x61] sm:$0xff] %v4341_v50  ;;  %v4352_v58 = vpack.c.bf16 %v4346_v18, %v1317_v8  ;;  %3403 = vmatprep.subr.bf16.mxu1 %v3650_v47  ;;  %v4359_v22 = vpack.c.bf16 %v4312_v49, %v4341_v50  ;;  %v1756_v52 = vpack.c.bf16 %v1317_v8, %v1316_v14  ;;  %v1600_v16 = vld [vmem:[#allocation2 + $0x22] sm:$0xff]  ;;  %v3673_v8 = vld [vmem:[%s4798_s3 + $0x150] sm:$0xff]  }
 0x134   : > { %v4383_v51 = vld [vmem:[#allocation2 + $0x70] sm:$0xff]  ;;  %v4421_v38 = vpack.c.bf16 %v4418_v59, %v1600_v16  ;;  %v3669_v44 = vld [vmem:[%s4798_s3 + $0x160] sm:$0xff]   ;;  %v2056_v5 = vpack.c.bf16 %v1600_v16, %v4348_v10  ;;  %v3675_v10 = vld [vmem:[%s4798_s3 + $0x148] sm:$0xff]  }
 0x135   : > { %3392 = vmatmul.mubr.bf16.vlgmr.msra.gmra.mxu0 %v4352_v58  ;;  %3372 = vmatmul.mubr.bf16.gmra.mxu1 %v4359_v22  ;;  %v4448_v19 = vld [vmem:[#allocation2 + $0x72] sm:$0xff]  ;;  %v3676_v18 = vld [vmem:[%s4798_s3 + $0x100] sm:$0xff]  }
 0x136   : > { %3424 = vmatpush3.bf16.msra.mxu0 %v4826_v17  ;;  %v4370_v33 = vld [vmem:[#allocation2 + $0x50] sm:$0xff]  ;;  %3404 = vmatpush3.bf16.msra.mxu1 %v3650_v47  ;;  %v3671_v47 = vld [vmem:[%s4798_s3 + $0x158] sm:$0xff]   ;;  %v1908_v17 = vpack.c.bf16 %v4341_v50, %v4323_v2  ;;  %v2057_v2 = vpack.c.bf16 %v4423_v13, %v4418_v59  ;;  %v3683_v50 = vld [vmem:[%s4798_s3 + $0x1e8] sm:$0xff]  }
 0x137   : > { %3425 = vmatprep.subr.bf16.mxu0 %v3649_v11  ;;  %v4374_v34 = vpack.c.bf16 %v4370_v33, %v4368_v30  ;;  %3415 = vmatprep.mubr.bf16.mxu1 %v1606_v55  ;;  %v4413_v25 = vld [vmem:[#allocation2 + $0x52] sm:$0xff]  ;;  %v3685_v49 = vld [vmem:[%s4798_s3 + $0x1e0] sm:$0xff]  }
 0x138   : > { %3405 = vmatprep.subr.bf16.mxu1 %v3652_v29  ;;  %v4427_v9 = vpack.c.bf16 %v4413_v25, %v4423_v13  ;;  %v4463_v14 = vld [vmem:[#allocation2 + $0x80] sm:$0xff]  ;;  %v3680_v55 = vld [vmem:[%s4798_s3 + $0x1b0] sm:$0xff]   ;;  %v3679_v30 = vld [vmem:[%s4798_s3 + $0x1f8] sm:$0xff]  }
 0x139   : > { %3395 = vmatprep.mubr.bf16.mxu0 %v4374_v34  ;;  %v1759_v15 = vpack.c.bf16 %v4463_v14, %v4383_v51  ;;  %v4827_v16 = vld [vmem:[#allocation6_spill] sm:$0xff]  ;;  %v4829_v59 = vld [vmem:[#allocation8_spill] sm:$0xff] }
 0x13a   : > { %3426 = vmatpush3.bf16.msra.mxu0 %v3649_v11  ;;  %v1321_v21 = vld [vmem:[#allocation2 + $0x60] sm:$0xff]  ;;  %3406 = vmatpush3.bf16.msra.mxu1 %v3652_v29  ;;  %v3678_v11 = vld [vmem:[%s4798_s3 + $0x1b8] sm:$0xff]  }
 0x13b   : > { %3427 = vmatprep.subr.bf16.mxu0 %v3651_v45  ;;  %v4386_v26 = vpack.c.bf16 %v4383_v51, %v1321_v21  ;;  %3407 = vmatprep.subr.bf16.mxu1 %v3654_v20  ;;  %v4440_v42 = vld [vmem:[#allocation2 + $0x62] sm:$0xff]  ;;  %v1758_v62 = vpack.c.bf16 %v1321_v21, %v4370_v33  ;;  %v2506_v13 = vld [vmem:[#allocation2 + $0x92] sm:$0xff] }
 0x13c   : > { %v4452_v28 = vpack.c.bf16 %v4448_v19, %v4440_v42  ;;  %v3677_v29 = vld [vmem:[%s4798_s3 + $0x140] sm:$0xff]   ;;  %v3682_v33 = vld [vmem:[%s4798_s3 + $0x1a8] sm:$0xff]   ;;  %v2058_v36 = vpack.c.bf16 %v4440_v42, %v4413_v25 }
 0x13d   : > { %3396 = vmatmul.mubr.bf16.gmra.mxu0 %v4386_v26  ;;  %v3690_v51 = vld [vmem:[%s4798_s3 + $0x188] sm:$0xff]  }
 0x13e   : > { %3428 = vmatpush3.bf16.msra.mxu0 %v3651_v45  ;;  %3439 = vmatprep.mubr.bf16.mxu0 %v1756_v52  ;;  %v4528_v45 = vld [vmem:[#allocation2 + $0x82] sm:$0xff] }
 0x13f   : > { %3429 = vmatprep.subr.bf16.mxu0 %v3653_v6  ;;  %3408 = vmatpush3.bf16.msra.mxu1 %v3654_v20  ;;  %v3686_v20 = vld [vmem:[%s4798_s3 + $0x198] sm:$0xff]   ;;  %v2059_v21 = vpack.c.bf16 %v4528_v45, %v4448_v19  ;;  %v3691_v52 = vld [vmem:[%s4798_s3 + $0x1c8] sm:$0xff]  }
 0x140   : > { %3409 = vmatprep.subr.bf16.mxu1 %v3656_v46  ;;  %v3700_v25 = vld [vmem:[%s4798_s3 + $0x208] sm:$0xff]  }
 0x142   : > { %3430 = vmatpush3.bf16.msra.mxu0 %v3653_v6  ;;  %v3689_v6 = vld [vmem:[%s4798_s3 + $0x1d0] sm:$0xff]  }
 0x143   : > { %3431 = vmatprep.subr.bf16.mxu0 %v3655_v61  ;;  %3410 = vmatpush3.bf16.msra.mxu1 %v3656_v46  ;;  %v3694_v46 = vld [vmem:[%s4798_s3 + $0x238] sm:$0xff]  }
 0x144   : > { %3411 = vmatprep.subr.bf16.mxu1 %v3658_v56 }
 0x146   : > { %3432 = vmatpush3.bf16.msra.mxu0 %v3655_v61  ;;  %v3693_v61 = vld [vmem:[%s4798_s3 + $0x1c0] sm:$0xff]  }
 0x147   : > { %3433 = vmatprep.subr.bf16.mxu0 %v3657_v57  ;;  %3412 = vmatpush3.bf16.msra.mxu1 %v3658_v56  ;;  %v3695_v56 = vld [vmem:[%s4798_s3 + $0x230] sm:$0xff]  }
 0x148   : > { %3413 = vmatprep.subr.bf16.mxu1 %v3660_v63 }
 0x14a   : > { %3434 = vmatpush3.bf16.msra.mxu0 %v3657_v57  ;;  %v2664_v57 = vld [vmem:[%s4800_s5] sm:$0xf] }
 0x14b   : > { %3435 = vmatprep.subr.bf16.mxu0 %v3659_v32  ;;  %3414 = vmatpush3.bf16.msra.mxu1 %v3660_v63  ;;  %v3696_v63 = vld [vmem:[%s4798_s3 + $0x228] sm:$0xff]  }
 0x14c   : > { %3447 = vmatprep.subr.bf16.mxu1 %v3662_v37 }
 0x14e   : > { %3436 = vmatpush3.bf16.msra.mxu0 %v3659_v32  ;;  %3416 = vmatmul.mubr.bf16.vlgmr.msra.gmra.mxu1 %v4421_v38  ;;  %v2673_v32 = vsel %vm353_vm0, %v2664_v57, 0 }
 0x14f   : > { %3437 = vmatprep.subr.bf16.mxu0 %v3661_v12  ;;  %3419 = vmatprep.mubr.bf16.mxu1 %v4427_v9 }
 0x150   : > { %3448 = vmatpush3.bf16.msra.mxu1 %v3662_v37  ;;  %v2356_v37 = vld [vmem:[#allocation2 + $0x91] sm:$0xff] }
 0x151   : > { %3449 = vmatprep.subr.bf16.mxu1 %v3664_v0 }
 0x152   : > { %3438 = vmatpush3.bf16.msra.mxu0 %v3661_v12  ;;  %v4828_v12 = vld [vmem:[#allocation7_spill] sm:$0xff] }
 0x153   : > { %3471 = vmatprep.subr.bf16.mxu0 %v3663_v1 }
 0x154   : > { %3450 = vmatpush3.bf16.msra.mxu1 %v3664_v0  ;;  %v2510_v0 = vpack.c.bf16 %v2506_v13, %v4528_v45 }
 0x155   : > { %3440 = vmatmul.mubr.bf16.vlgmr.msra.gmra.mxu0 %v1757_v23  ;;  %3451 = vmatprep.subr.bf16.mxu1 %v3666_v39 }
 0x156   : > { %3443 = vmatprep.mubr.bf16.mxu0 %v1758_v62  ;;  %3472 = vmatpush3.bf16.msra.mxu0 %v3663_v1 }
 0x157   : > { %3473 = vmatprep.subr.bf16.mxu0 %v3665_v48  ;;  %3420 = vmatmul.mubr.bf16.gmra.mxu1 %v4452_v28 }
 0x158   : > { %3452 = vmatpush3.bf16.msra.mxu1 %v3666_v39  ;;  %3463 = vmatprep.mubr.bf16.mxu1 %v1906_v53 }
 0x159   : > { %3453 = vmatprep.subr.bf16.mxu1 %v3668_v40 }
 0x15a   : > { %3474 = vmatpush3.bf16.msra.mxu0 %v3665_v48 }
 0x15b   : > { %3475 = vmatprep.subr.bf16.mxu0 %v3667_v3 }
 0x15c   : > { %3454 = vmatpush3.bf16.msra.mxu1 %v3668_v40 }
 0x15d   : > { %3444 = vmatmul.mubr.bf16.gmra.mxu0 %v1759_v15  ;;  %3455 = vmatprep.subr.bf16.mxu1 %v3670_v27 }
 0x15e   : > { %3476 = vmatpush3.bf16.msra.mxu0 %v3667_v3  ;;  %3487 = vmatprep.mubr.bf16.mxu0 %v2056_v5 }
 0x15f   : > { %3477 = vmatprep.subr.bf16.mxu0 %v3669_v44 }
 0x160   : > { %3456 = vmatpush3.bf16.msra.mxu1 %v3670_v27 }
 0x161   : > { %3457 = vmatprep.subr.bf16.mxu1 %v3672_v60 }
 0x162   : > { %3478 = vmatpush3.bf16.msra.mxu0 %v3669_v44 }
 0x163   : > { %3479 = vmatprep.subr.bf16.mxu0 %v3671_v47 }
 0x164   : > { %3458 = vmatpush3.bf16.msra.mxu1 %v3672_v60 }
 0x165   : > { %3459 = vmatprep.subr.bf16.mxu1 %v3674_v41 }
 0x166   : > { %3480 = vmatpush3.bf16.msra.mxu0 %v3671_v47 }
 0x167   : > { %3481 = vmatprep.subr.bf16.mxu0 %v3673_v8 }
 0x168   : > { %3460 = vmatpush3.bf16.msra.mxu1 %v3674_v41 }
 0x169   : > { %3461 = vmatprep.subr.bf16.mxu1 %v3676_v18 }
 0x16a   : > { %3482 = vmatpush3.bf16.msra.mxu0 %v3673_v8 }
 0x16b   : > { %3483 = vmatprep.subr.bf16.mxu0 %v3675_v10 }
 0x16c   : > { %3462 = vmatpush3.bf16.msra.mxu1 %v3676_v18 }
 0x16d   : > { %3495 = vmatprep.subr.bf16.mxu1 %v3678_v11 }
 0x16e   : > { %3484 = vmatpush3.bf16.msra.mxu0 %v3675_v10 }
 0x16f   : > { %3485 = vmatprep.subr.bf16.mxu0 %v3677_v29  ;;  %3464 = vmatmul.mubr.bf16.vlgmr.msra.gmra.mxu1 %v1907_v54  ;;  %v3684_v54 = vld [vmem:[%s4798_s3 + $0x1a0] sm:$0xff]  }
 0x170   : > { %3467 = vmatprep.mubr.bf16.mxu1 %v1908_v17  ;;  %3496 = vmatpush3.bf16.msra.mxu1 %v3678_v11 }
 0x171   : > { %3497 = vmatprep.subr.bf16.mxu1 %v3680_v55 }
 0x172   : > { %3486 = vmatpush3.bf16.msra.mxu0 %v3677_v29 }
 0x173   : > { %3519 = vmatprep.subr.bf16.mxu0 %v3679_v30 }
 0x174   : > { %3498 = vmatpush3.bf16.msra.mxu1 %v3680_v55 }
 0x175   : > { %3488 = vmatmul.mubr.bf16.vlgmr.msra.gmra.mxu0 %v2057_v2  ;;  %3499 = vmatprep.subr.bf16.mxu1 %v3682_v33 }
 0x176   : > { %3491 = vmatprep.mubr.bf16.mxu0 %v2058_v36  ;;  %3520 = vmatpush3.bf16.msra.mxu0 %v3679_v30 }
 0x177   : > { %3521 = vmatprep.subr.bf16.mxu0 %v3681_v35  ;;  %3468 = vmatmul.mubr.bf16.gmra.mxu1 %v1909_v43  ;;  %v3688_v43 = vld [vmem:[%s4798_s3 + $0x190] sm:$0xff]  }
 0x178   : > { %3500 = vmatpush3.bf16.msra.mxu1 %v3682_v33  ;;  %3511 = vmatprep.mubr.bf16.mxu1 %v4352_v58  ;;  %v3687_v58 = vld [vmem:[%s4798_s3 + $0x1d8] sm:$0xff]  }
 0x179   : > { %3501 = vmatprep.subr.bf16.mxu1 %v3684_v54 }
 0x17a   : > { %3522 = vmatpush3.bf16.msra.mxu0 %v3681_v35 }
 0x17b   : > { %3523 = vmatprep.subr.bf16.mxu0 %v3683_v50 }
 0x17c   : > { %3502 = vmatpush3.bf16.msra.mxu1 %v3684_v54 }
 0x17d   : > { %3492 = vmatmul.mubr.bf16.gmra.mxu0 %v2059_v21  ;;  %3503 = vmatprep.subr.bf16.mxu1 %v3686_v20 }
 0x17e   : > { %3524 = vmatpush3.bf16.msra.mxu0 %v3683_v50  ;;  %3535 = vmatprep.mubr.bf16.mxu0 %v4317_v24  ;;  %v3692_v24 = vld [vmem:[%s4798_s3 + $0x180] sm:$0xff]  }
 0x17f   : > { %3525 = vmatprep.subr.bf16.mxu0 %v3685_v49 }
 0x180   : > { %3504 = vmatpush3.bf16.msra.mxu1 %v3686_v20 }
 0x181   : > { %3505 = vmatprep.subr.bf16.mxu1 %v3688_v43 }
 0x182   : > { %3526 = vmatpush3.bf16.msra.mxu0 %v3685_v49 }
 0x183   : > { %3527 = vmatprep.subr.bf16.mxu0 %v3687_v58 }
 0x184   : > { %3506 = vmatpush3.bf16.msra.mxu1 %v3688_v43 }
 0x185   : > { %3507 = vmatprep.subr.bf16.mxu1 %v3690_v51 }
 0x186   : > { %3528 = vmatpush3.bf16.msra.mxu0 %v3687_v58 }
 0x187   : > { %3529 = vmatprep.subr.bf16.mxu0 %v3689_v6 }
 0x188   : > { %3508 = vmatpush3.bf16.msra.mxu1 %v3690_v51 }
 0x189   : > { %3509 = vmatprep.subr.bf16.mxu1 %v3692_v24 }
 0x18a   : > { %3530 = vmatpush3.bf16.msra.mxu0 %v3689_v6 }
 0x18b   : > { %3531 = vmatprep.subr.bf16.mxu0 %v3691_v52 }
 0x18c   : > { %3510 = vmatpush3.bf16.msra.mxu1 %v3692_v24 }
 0x18d   : > { %3543 = vmatprep.subr.bf16.mxu1 %v3694_v46 }
 0x18e   : > { %3532 = vmatpush3.bf16.msra.mxu0 %v3691_v52 }
 0x18f   : > { %3533 = vmatprep.subr.bf16.mxu0 %v3693_v61  ;;  %3512 = vmatmul.mubr.bf16.vlgmr.msra.gmra.mxu1 %v4374_v34  ;;  %v2210_v34 = vpack.c.bf16 %v4825_v7, %v4463_v14  ;;  %v2360_v7 = vpack.c.bf16 %v2356_v37, %v4329_v4  ;;  %v3701_v4 = vld [vmem:[%s4798_s3 + $0x200] sm:$0xff]  }
 0x190   : > { %3515 = vmatprep.mubr.bf16.mxu1 %v4386_v26  ;;  %3544 = vmatpush3.bf16.msra.mxu1 %v3694_v46  ;;  %v3697_v26 = vld [vmem:[%s4798_s3 + $0x220] sm:$0xff]  }
 0x191   : > { %3545 = vmatprep.subr.bf16.mxu1 %v3695_v56 }
 0x192   : > { %3534 = vmatpush3.bf16.msra.mxu0 %v3693_v61 }
 0x193   : > { %3586 = vmatprep.subr.msk.bf16.mxu0 %vm353_vm0, %v2664_v57 }
 0x194   : > { %3546 = vmatpush3.bf16.msra.mxu1 %v3695_v56 }
 0x195   : > { %3536 = vmatmul.mubr.bf16.vlgmr.msra.gmra.mxu0 %v4335_v31  ;;  %3547 = vmatprep.subr.bf16.mxu1 %v3696_v63  ;;  %v3698_v31 = vld [vmem:[%s4798_s3 + $0x218] sm:$0xff]  }
 0x196   : > { %3539 = vmatprep.mubr.bf16.mxu0 %v4359_v22  ;;  %3568 = vmatpush3.bf16.msra.mxu0 %v2673_v32  ;;  %v3699_v22 = vld [vmem:[%s4798_s3 + $0x210] sm:$0xff]  }
 0x197   : > { %3516 = vmatmul.mubr.bf16.gmra.mxu1 %v2210_v34 }
 0x198   : > { %3548 = vmatpush3.bf16.msra.mxu1 %v3696_v63  ;;  %3559 = vmatprep.mubr.bf16.mxu1 %v4421_v38  ;;  %v4830_v38 = vld [vmem:[#allocation9_spill] sm:$0xff] }
 0x199   : > { %3549 = vmatprep.subr.bf16.mxu1 %v3697_v26 }
 0x19c   : > { %3550 = vmatpush3.bf16.msra.mxu1 %v3697_v26 }
 0x19d   : > { %3540 = vmatmul.mubr.bf16.gmra.mxu0 %v2360_v7  ;;  %3551 = vmatprep.subr.bf16.mxu1 %v3698_v31 }
 0x19e   : > { %3569 = vmatprep.mubr.msk.bf16.mxu0 %vm340_vm1, %v4827_v16 }
 0x1a0   : > { %3552 = vmatpush3.bf16.msra.mxu1 %v3698_v31 }
 0x1a1   : > { %3553 = vmatprep.subr.bf16.mxu1 %v3699_v22 }
 0x1a4   : > { %3554 = vmatpush3.bf16.msra.mxu1 %v3699_v22 }
 0x1a5   : > { %3555 = vmatprep.subr.bf16.mxu1 %v3700_v25  ;;  %3570 = vmatmul.mubr.msk.bf16.vlgmr.msra.gmra.mxu0 %vm340_vm1, %v4828_v12 }
 0x1a6   : > { %3573 = vmatprep.mubr.msk.bf16.mxu0 %vm340_vm1, %v4829_v59 }
 0x1a8   : > { %3556 = vmatpush3.bf16.msra.mxu1 %v3700_v25 }
 0x1a9   : > { %3557 = vmatprep.subr.bf16.mxu1 %v3701_v4 }
 0x1ac   : > { %3558 = vmatpush3.bf16.msra.mxu1 %v3701_v4 }
 0x1ad   : > { %3574 = vmatmul.mubr.msk.bf16.gmra.mxu0 %vm340_vm1, %v4830_v38 }
 0x1af   : > { %3560 = vmatmul.mubr.bf16.vlgmr.msra.gmra.mxu1 %v4427_v9 }
 0x1b0   : > { %3563 = vmatprep.mubr.bf16.mxu1 %v4452_v28 }
 0x1b7   : > { %3564 = vmatmul.mubr.bf16.gmra.mxu1 %v2510_v0 }
 0x1ed   : > { %v3369_v1 = vpop.f32.mrf.mxu1 }
 0x1ef   : > { %v1454_v42 = vpop.f32.mrf.mxu1 }
 0x1f1   : > { %v3370_v48 = vpop.f32.mrf.mxu1 }
 0x1f3   : > { %v4609_v19 = vpop.f32.mrf.mxu1 }
 0x1f5   : > { %v3393_v39 = vpop.f32.mrf.mxu0  ;;  %v4611_v53 = vpop.f32.mrf.mxu1 }
 0x1f6   : > { %v1576_v59 = vadd.f32 %v3393_v39, %v3369_v1 }
 0x1f7   : > { %v1567_v23 = vpop.f32.mrf.mxu0  ;;  %v4615_v9 = vpop.f32.mrf.mxu1 }
 0x1f8   : > { %v1568_v13 = vadd.f32 %v1567_v23, %v1454_v42 }
 0x1f9   : > { %v3394_v62 = vpop.f32.mrf.mxu0  ;;  %v4619_v14 = vpop.f32.mrf.mxu1 }
 0x1fb   : > { %v1570_v40 = vpop.f32.mrf.mxu0  ;;  %v4623_v15 = vpop.f32.mrf.mxu1 }
 0x1fd   : > { %v4613_v3 = vpop.f32.mrf.mxu0 }
 0x1ff   : > { %v4617_v28 = vpop.f32.mrf.mxu0 }
 0x200   : > { %v1584_v23 = vadd.f32 %v4617_v28, %v4615_v9 }
 0x201   : > { %v4621_v27 = vpop.f32.mrf.mxu0 }
 0x203   : > { %v4625_v5 = vpop.f32.mrf.mxu0 }
 0x20e   : > { %v3417_v44 = vpop.f32.mrf.mxu1 }
 0x20f   : > { %v1742_v0 = vadd.f32 %v3417_v44, %v1576_v59 }
 0x210   : > { %v1709_v47 = vpop.f32.mrf.mxu1 }
 0x212   : > { %v3418_v8 = vpop.f32.mrf.mxu1 }
 0x214   : > { %v1712_v10 = vpop.f32.mrf.mxu1 }
 0x215   : > { %v3441_v60 = vpop.f32.mrf.mxu0 }
 0x217   : > { %v1859_v41 = vpop.f32.mrf.mxu0  ;;  %v3421_v29 = vpop.f32.mrf.mxu1 }
 0x219   : > { %v3442_v18 = vpop.f32.mrf.mxu0  ;;  %v1725_v17 = vpop.f32.mrf.mxu1 }
 0x21b   : > { %v1862_v11 = vpop.f32.mrf.mxu0  ;;  %v4631_v33 = vpop.f32.mrf.mxu1 }
 0x21d   : > { %v4627_v55 = vpop.f32.mrf.mxu0  ;;  %v1728_v35 = vpop.f32.mrf.mxu1 }
 0x21f   : > { %v4629_v30 = vpop.f32.mrf.mxu0 }
 0x221   : > { %v4633_v2 = vpop.f32.mrf.mxu0 }
 0x223   : > { %v4635_v54 = vpop.f32.mrf.mxu0 }
 0x22f   : > { %v3465_v36 = vpop.f32.mrf.mxu1 }
 0x231   : > { %v2009_v45 = vpop.f32.mrf.mxu1 }
 0x233   : > { %v3466_v21 = vpop.f32.mrf.mxu1 }
 0x235   : > { %v3489_v50 = vpop.f32.mrf.mxu0  ;;  %v2012_v43 = vpop.f32.mrf.mxu1 }
 0x237   : > { %v2159_v20 = vpop.f32.mrf.mxu0  ;;  %v4639_v51 = vpop.f32.mrf.mxu1 }
 0x239   : > { %v3490_v49 = vpop.f32.mrf.mxu0  ;;  %v4643_v24 = vpop.f32.mrf.mxu1 }
 0x23a   : > { %4831 = vst [vmem:[#allocation12_spill] sm:$0xff] %v4643_v24 }
 0x23b   : > { %v4637_v58 = vpop.f32.mrf.mxu0  ;;  %v4647_v46 = vpop.f32.mrf.mxu1 }
 0x23c   : > { %4833 = vst [vmem:[#allocation10_spill] sm:$0xff] %v4647_v46 }
 0x23d   : > { %v4641_v6 = vpop.f32.mrf.mxu0  ;;  %v4651_v56 = vpop.f32.mrf.mxu1 }
 0x23e   : > { %4835 = vst [vmem:[#allocation6_spill] sm:$0xff] %v4651_v56  ;;  %v1571_v56 = vadd.f32 %v1570_v40, %v4609_v19  ;;  %v1595_v19 = vadd.f32 %v4621_v27, %v4619_v14  ;;  %v1587_v40 = vadd.f32 %v4625_v5, %v4623_v15  ;;  %v4687_v14 = vld [vmem:[%s4801_s6] ss:$0 sm:$0xff] }
 0x23f   : > { %v4645_v52 = vpop.f32.mrf.mxu0 }
 0x240   : > { %4832 = vst [vmem:[#allocation13_spill] sm:$0xff] %v4645_v52  ;;  %v1579_v52 = vadd.f32 %v3394_v62, %v3370_v48  ;;  %v1741_v1 = vadd.f32 %v1712_v10, %v1571_v56  ;;  %v1747_v9 = vadd.f32 %v4631_v33, %v1595_v19  ;;  %v1745_v28 = vadd.f32 %v1728_v35, %v1587_v40 }
 0x241   : > { %v4649_v61 = vpop.f32.mrf.mxu0 }
 0x242   : > { %4834 = vst [vmem:[#allocation11_spill] sm:$0xff] %v4649_v61 }
 0x243   : > { %v4653_v63 = vpop.f32.mrf.mxu0 }
 0x244   : > { %4836 = vst [vmem:[#allocation7_spill] sm:$0xff] %v4653_v63 }
 0x245   : > { %v4844_v56 = vld [vmem:[#allocation6_spill] sm:$0xff] }
 0x24f   : > { %v3513_v57 = vpop.f32.mrf.mxu1 }
 0x251   : > { %v2310_v34 = vpop.f32.mrf.mxu1 }
 0x253   : > { %v3514_v37 = vpop.f32.mrf.mxu1 }
 0x255   : > { %v3537_v32 = vpop.f32.mrf.mxu0  ;;  %v2313_v22 = vpop.f32.mrf.mxu1 }
 0x257   : > { %v2460_v26 = vpop.f32.mrf.mxu0  ;;  %v4663_v4 = vpop.f32.mrf.mxu1 }
 0x259   : > { %v4655_v31 = vpop.f32.mrf.mxu0  ;;  %v4669_v63 = vpop.f32.mrf.mxu1 }
 0x25a   : > { %4837 = vst [vmem:[#allocation8_spill] sm:$0xff] %v4655_v31  ;;  %v1892_v31 = vadd.f32 %v3441_v60, %v1742_v0  ;;  %v1891_v60 = vadd.f32 %v1862_v11, %v1741_v1 }
 0x25b   : > { %v4657_v7 = vpop.f32.mrf.mxu0  ;;  %v4674_v39 = vpop.f32.mrf.mxu1 }
 0x25c   : > { %4838 = vst [vmem:[#allocation9_spill] sm:$0xff] %v4657_v7  ;;  %v1740_v7 = vadd.f32 %v1709_v47, %v1568_v13  ;;  %v2042_v24 = vadd.f32 %v3465_v36, %v1892_v31 }
 0x25d   : > { %v4659_v16 = vpop.f32.mrf.mxu0  ;;  %v2329_v36 = vpop.f32.mrf.mxu1 }
 0x25e   : > { %4839 = vst [vmem:[#allocation14_spill] sm:$0xff] %v4659_v16  ;;  %v1890_v46 = vadd.f32 %v1859_v41, %v1740_v7  ;;  %v2192_v48 = vadd.f32 %v3489_v50, %v2042_v24  ;;  %v1744_v41 = vadd.f32 %v1725_v17, %v1584_v23  ;;  %v1897_v17 = vadd.f32 %v4633_v2, %v1747_v9  ;;  %v4847_v7 = vld [vmem:[#allocation11_spill] sm:$0xff] }
 0x25f   : > { %v4661_v25 = vpop.f32.mrf.mxu0 }
 0x260   : > { %4840 = vst [vmem:[#allocation15_spill] sm:$0xff] %v4661_v25  ;;  %v1743_v25 = vadd.f32 %v3418_v8, %v1579_v52  ;;  %v2040_v62 = vadd.f32 %v2009_v45, %v1890_v46  ;;  %v2343_v8 = vadd.f32 %v3513_v57, %v2192_v48  ;;  %v1894_v15 = vadd.f32 %v4629_v30, %v1744_v41  ;;  %v4698_v45 = vld [vmem:[%s4799_s4] ss:$0 sm:$0xff] }
 0x261   : > { %v4665_v12 = vpop.f32.mrf.mxu0 }
 0x262   : > { %4841 = vst [vmem:[#allocation16_spill] sm:$0xff] %v4665_v12  ;;  %v1592_v12 = vadd.f32 %v4613_v3, %v4611_v53  ;;  %v1893_v44 = vadd.f32 %v3442_v18, %v1743_v25  ;;  %v2190_v53 = vadd.f32 %v2159_v20, %v2040_v62  ;;  %v2041_v18 = vadd.f32 %v2012_v43, %v1891_v60 }
 0x263   : > { %v4667_v38 = vpop.f32.mrf.mxu0  ;;  %v2493_v11 = vadd.f32 %v3537_v32, %v2343_v8  ;;  %v4845_v32 = vld [vmem:[#allocation8_spill] sm:$0xff]  ;;  %v4848_v25 = vld [vmem:[#allocation9_spill] sm:$0xff] }
 0x264   : > { %v1746_v47 = vadd.f32 %v3421_v29, %v1592_v12  ;;  %v2043_v3 = vadd.f32 %v3466_v21, %v1893_v44  ;;  %v2341_v29 = vadd.f32 %v2310_v34, %v2190_v53  ;;  %v2191_v33 = vadd.f32 %v4637_v58, %v2041_v18  ;;  %v4843_v58 = vld [vmem:[#allocation10_spill] sm:$0xff]  ;;  %v4849_v44 = vld [vmem:[#allocation7_spill] sm:$0xff] }
 0x265   : > { %v3571_v61 = vpop.f32.mrf.mxu0  ;;  %v2047_v24 = vadd.f32 %v4843_v58, %v1897_v17  ;;  %v4850_v62 = vld [vmem:[#allocation14_spill] sm:$0xff] }
 0x266   : > { %v1896_v10 = vadd.f32 %v4627_v55, %v1746_v47  ;;  %v2193_v5 = vadd.f32 %v3490_v49, %v2043_v3  ;;  %v1895_v55 = vadd.f32 %v4635_v54, %v1745_v28  ;;  %v2491_v30 = vadd.f32 %v2460_v26, %v2341_v29  ;;  %v4842_v54 = vld [vmem:[#allocation12_spill] sm:$0xff] }
 0x267   : > { %v2709_v16 = vpop.f32.mrf.mxu0  ;;  %v2718_v21 = vadd.f32 %v3571_v61, %v4687_v14  ;;  %v2044_v43 = vadd.f32 %v4842_v54, %v1894_v15  ;;  %v4846_v61 = vld [vmem:[#allocation13_spill] sm:$0xff] }
 0x268   : > { %v2046_v35 = vadd.f32 %v4639_v51, %v1896_v10  ;;  %v2344_v20 = vadd.f32 %v3514_v37, %v2193_v5  ;;  %v2342_v51 = vadd.f32 %v2313_v22, %v2191_v33  ;;  %v2045_v57 = vadd.f32 %v4844_v56, %v1895_v55 }
 0x269   : > { %v3572_v42 = vpop.f32.mrf.mxu0  ;;  %v2194_v31 = vadd.f32 %v4846_v61, %v2044_v43  ;;  %v2710_v13 = vadd.f32 %v4687_v14, %v2709_v16  ;;  %v4851_v16 = vld [vmem:[#allocation15_spill] sm:$0xff]  ;;  %v4852_v29 = vld [vmem:[#allocation16_spill] sm:$0xff] }
 0x26a   : > { %v2196_v2 = vadd.f32 %v4641_v6, %v2046_v35  ;;  %v2494_v34 = vadd.f32 %v4845_v32, %v2344_v20  ;;  %v2197_v6 = vadd.f32 %v4847_v7, %v2047_v24  ;;  %v2492_v12 = vadd.f32 %v4848_v25, %v2342_v51 }
 0x26b   : > { %v2712_v27 = vpop.f32.mrf.mxu0  ;;  %v2195_v48 = vadd.f32 %v4849_v44, %v2045_v57  ;;  %v2345_v40 = vadd.f32 %v4669_v63, %v2194_v31  ;;  %v2721_v60 = vadd.f32 %v3572_v42, %v4687_v14 }
 0x26c   : > { %v2347_v59 = vadd.f32 %v4663_v4, %v2196_v2  ;;  %v2348_v9 = vadd.f32 %v4674_v39, %v2197_v6  ;;  %v2713_v28 = vadd.f32 %v4687_v14, %v2712_v27 }
 0x26d   : > { %v3575_v46 = vpop.f32.mrf.mxu0  ;;  %v2495_v10 = vadd.f32 %v4851_v16, %v2345_v40  ;;  %v2346_v55 = vadd.f32 %v2329_v36, %v2195_v48 }
 0x26e   : > { %v2497_v19 = vadd.f32 %v4850_v62, %v2347_v59  ;;  %v2734_v18 = vadd.f32 %v3575_v46, %v4687_v14  ;;  %v2498_v17 = vadd.f32 %v4852_v29, %v2348_v9 }
 0x26f   : > { %v3561_v50 = vpop.f32.mrf.mxu1  ;;  %v2725_v41 = vpop.f32.mrf.mxu0  ;;  %v2496_v20 = vadd.f32 %v4667_v38, %v2346_v55 }
 0x270   : > { %v2643_v49 = vadd.f32 %v3561_v50, %v2493_v11 }
 0x271   : > { %v2610_v52 = vpop.f32.mrf.mxu1  ;;  %v3576_v39 = vpop.f32.mrf.mxu0 }
 0x272   : > { %v2658_v26 = vadd.f32 %v4698_v45, %v2643_v49  ;;  %v2641_v37 = vadd.f32 %v2610_v52, %v2491_v30  ;;  %v2737_v58 = vadd.f32 %v3576_v39, %v4687_v14 }
 0x273   : > { %v3562_v22 = vpop.f32.mrf.mxu1  ;;  %v2728_v24 = vpop.f32.mrf.mxu0 }
 0x274   : > { %v2742_v0 = vadd.f32 %v2718_v21, %v2658_v26  ;;  %v2656_v1 = vadd.f32 %v4698_v45, %v2641_v37  ;;  %v2644_v23 = vadd.f32 %v3562_v22, %v2494_v34  ;;  %v2726_v21 = vadd.f32 %v4687_v14, %v2725_v41 }
 0x275   : > { %v2613_v47 = vpop.f32.mrf.mxu1  ;;  %v2729_v32 = vadd.f32 %v4687_v14, %v2728_v24 }
 0x276   : > { %v2750_v53 = vmax.f32 %v2742_v0, 0.0  ;;  %v2740_v3 = vadd.f32 %v2710_v13, %v2656_v1  ;;  %v2659_v4 = vadd.f32 %v4698_v45, %v2644_v23  ;;  %v2642_v8 = vadd.f32 %v2613_v47, %v2492_v12 }
 0x277   : > { %v3565_v15 = vpop.f32.mrf.mxu1 }
 0x278   : > { %2758 = vst [vmem:[%s4724_s22 + $0x10] sm:$0xff] %v2750_v53  ;;  %v2748_v63 = vmax.f32 %v2740_v3, 0.0  ;;  %v2743_v42 = vadd.f32 %v2721_v60, %v2659_v4  ;;  %v2657_v5 = vadd.f32 %v4698_v45, %v2642_v8  ;;  %v2647_v11 = vadd.f32 %v3565_v15, %v2497_v19 }
 0x279   : > { %v2626_v33 = vpop.f32.mrf.mxu1 }
 0x27a   : > { %2756 = vst [vmem:[%s4724_s22] sm:$0xff] %v2748_v63  ;;  %v2751_v27 = vmax.f32 %v2743_v42, 0.0  ;;  %v2741_v35 = vadd.f32 %v2713_v28, %v2657_v5  ;;  %v2662_v50 = vadd.f32 %v4698_v45, %v2647_v11  ;;  %v2645_v30 = vadd.f32 %v2626_v33, %v2495_v10 }
 0x27b   : > { %v3566_v49 = vpop.f32.mrf.mxu1 }
 0x27c   : > { %2759 = vst [vmem:[%s4724_s22 + $0x18] sm:$0xff] %v2751_v27  ;;  %v2749_v2 = vmax.f32 %v2741_v35, 0.0  ;;  %v2746_v54 = vadd.f32 %v2734_v18, %v2662_v50  ;;  %v2660_v36 = vadd.f32 %v4698_v45, %v2645_v30  ;;  %v2648_v43 = vadd.f32 %v3566_v49, %v2498_v17 }
 0x27d   : > { %v2629_v51 = vpop.f32.mrf.mxu1 }
 0x27e   : > { %2757 = vst [vmem:[%s4724_s22 + $0x8] sm:$0xff] %v2749_v2  ;;  %v2754_v52 = vmax.f32 %v2746_v54, 0.0  ;;  %v2744_v38 = vadd.f32 %v2726_v21, %v2660_v36  ;;  %v2663_v46 = vadd.f32 %v4698_v45, %v2648_v43  ;;  %v2646_v56 = vadd.f32 %v2629_v51, %v2496_v20 }
 0x280   : > { %2762 = vst [vmem:[%s4724_s22 + $0x30] sm:$0xff] %v2754_v52  ;;  %v2752_v57 = vmax.f32 %v2744_v38, 0.0  ;;  %v2747_v34 = vadd.f32 %v2737_v58, %v2663_v46  ;;  %v2661_v26 = vadd.f32 %v4698_v45, %v2646_v56 }
 0x282   : > { %2760 = vst [vmem:[%s4724_s22 + $0x20] sm:$0xff] %v2752_v57  ;;  %v2755_v37 = vmax.f32 %v2747_v34, 0.0  ;;  %v2745_v61 = vadd.f32 %v2729_v32, %v2661_v26 }
 0x284   : > { %2763 = vst [vmem:[%s4724_s22 + $0x38] sm:$0xff] %v2755_v37  ;;  %v2753_v14 = vmax.f32 %v2745_v61, 0.0 }
 0x286   : > { %2761 = vst [vmem:[%s4724_s22 + $0x28] sm:$0xff] %v2753_v14 }
 0x287   : > { %3715 = shalt.err (!%p3712_p3)
}
 0x288   : > { %s3716_s18 = scalar_lea.hbm %s4747_s13, 1024  ;;  %s3720_s21 = scalar_lea.hbm %s4802_s7, 2048 }
 0x289   : > { %p3717_p4 = scmp.ne.s32.totalorder %s4747_s13, %s3716_s18  ;;  %p3721_p9 = scmp.lt.s32.totalorder %s4747_s13, %s4802_s7 }
 0x28a   : > { %p3722_p10 = scmp.lt.s32.totalorder %s3720_s21, %s3716_s18 }
 0x28b   : > { %p3718_p7 = pnand %p3717_p4, %p3846_p5 }
 0x28c   : > { %p3723_p11 = por %p3722_p10, %p3721_p9 }
 0x28d   : > { %p3719_p8 = pneg %p3718_p7 }
 0x28f   : > { %p3724_p12 = pnand %p3723_p11, %p3719_p8 }
 0x291   : > { %3727 = shalt.err (!%p3724_p12)
}
 0x292   : > { %s3766_s8 = smov 128   ;;  %s3767_s9 = smov 8  }
 0x293   : > { %3588 = dma.vmem_to_hbm [thread:$0]  (%p3846_p5), %s4749_s29, 1024, %s4747_s13, %s4755_s14, %s3766_s8, %s3766_s8, %s3767_s9  }
 0x294 PF: > { %p3594_p13 = scmp.ge.s32.totalorder %s3762_s27, 2  ;;  %s2793_s28 = sand.u32 1, %s3750_s24  }
 0x295   : > { %s2794_s15 = scalar_lea.sflag [#allocation4], %s2793_s28 }
 0x296   : > { %p3591_p0 = pnand %p3594_p13, %p3850_p6 }
 0x298   : > { %p3592_p1 = pneg %p3591_p0 }
 0x29a   : > { %3745 = dma.done.wait (%p3592_p1), %s2794_s15, 1024  }
 0x29b   : > { %3747 = vsyncadd (%p3592_p1), %s2794_s15, 4294966272  ;;  %p17_p2 = scmp.ge.s32.totalorder %s3833_s30, 4   ;;  %s4853_s24 = smov %s3754_s25 }
 0x29c   : > { %s4854_s25 = smov %s3758_s26  ;;  %s4855_s26 = smov %s3844_s10 }
 0x29d   : > { %s4856_s27 = smov %s3833_s30  ;;  %19 = sbr.rel (!%p17_p2) target bundleno = 3 (0x3), region = 101 }
 0x2a2   :  { %2799 = vsyncpa [#allocation4], 1 }
 0x2a3   :  { %2801 = vsyncpa [#allocation4 + $0x1], 1 }

</bundles_post_ra>
